<compile_context>
chip_gen: v7x
topology: tpu7x:2x2x1
jax: 0.10.0
libtpu: 0.0.40
codegen_flags: <defaults>
</compile_context>

<pallas_src>
import jax
import jax.numpy as jnp
from jax.experimental import pallas as pl
from jax.experimental.pallas import tpu as pltpu

M_OUT = 16        # M in the reference code
M_PAD = 128       # lane-padded logits width (full 128-lane vreg)
NN_R = 512        # hidden width
IN_HALF = 4       # each of in_message / in_channel is 4-wide
IN_CAT = 2 * IN_HALF
MAX_TB = 2048     # max batch-tile rows per grid step
NEG_BIG = -1e30   # finite "minus infinity" for padded logit lanes


def _round_up(x, m):
    return ((x + m - 1) // m) * m


def _decoder_kernel(x_ref,
                    w1_ref, b1_ref,
                    w2_ref, b2_ref,
                    w3_ref, b3_ref,
                    w4_ref, b4_ref,
                    o_ref):
    """One batch tile of the full MLP + log_softmax (weights VMEM-resident)."""
    # fc1 + ReLU (bf16 MXU, f32 accumulate, bf16 elementwise)
    h = jnp.dot(x_ref[...], w1_ref[...],
                preferred_element_type=jnp.float32).astype(jnp.bfloat16)
    h = jnp.maximum(h + b1_ref[...], 0)

    # fc2 + ReLU
    h = jnp.dot(h, w2_ref[...],
                preferred_element_type=jnp.float32).astype(jnp.bfloat16)
    h = jnp.maximum(h + b2_ref[...], 0)

    # fc3 + ReLU
    h = jnp.dot(h, w3_ref[...],
                preferred_element_type=jnp.float32).astype(jnp.bfloat16)
    h = jnp.maximum(h + b3_ref[...], 0)

    # fc4 (lane-padded to 128 cols) + numerically stable log_softmax in f32.
    # Padded columns have zero weights and -1e30 bias -> exp() == 0, so they
    # do not perturb the real 16 logits and are sliced off in the wrapper.
    logits = jnp.dot(h, w4_ref[...],
                     preferred_element_type=jnp.float32) + b4_ref[...]
    m = jnp.max(logits, axis=-1, keepdims=True)
    shifted = logits - m
    lse = jnp.log(jnp.sum(jnp.exp(shifted), axis=-1, keepdims=True))
    o_ref[...] = (shifted - lse).astype(o_ref.dtype)


@jax.jit
def decoder_forward(in_message, in_channel, params):
    """in_message: (B, 4) f32, in_channel: (B, 4) f32 -> (B, 16) f32 log-probs."""
    w1, b1, w2, b2, w3, b3, w4, b4 = params
    B = in_message.shape[0]

    # Fold the concat into the wrapper: one streamed (B, 8) bf16 input.
    x = jnp.concatenate([in_message, in_channel], axis=-1).astype(jnp.bfloat16)

    # Lane-pad fc4: zero weight columns, large-negative bias columns.
    w4p = jnp.pad(w4, ((0, 0), (0, M_PAD - M_OUT))).astype(jnp.bfloat16)
    b4p = jnp.pad(b4.astype(jnp.float32), ((0, 0), (0, M_PAD - M_OUT)),
                  constant_values=NEG_BIG)

    # Batch tiling: large tiles (<= MAX_TB) to amortize per-step overhead,
    # sized to minimize padding; multiples of 16 for bf16 sublane packing.
    # For batches larger than one tile the grid has >= 2 steps, keeping both
    # v7x TensorCores busy via the "parallel" grid axis.
    B16 = _round_up(B, 16)
    num_tiles = -(-B16 // MAX_TB)
    TB = _round_up(-(-B16 // num_tiles), 16)
    B_pad = num_tiles * TB
    if B_pad != B:
        x = jnp.pad(x, ((0, B_pad - B), (0, 0)))

    def const_spec(shape):      # weights / biases: resident, fetched once
        return pl.BlockSpec(shape, lambda i: (0, 0))

    out = pl.pallas_call(
        _decoder_kernel,
        out_shape=jax.ShapeDtypeStruct((B_pad, M_PAD), jnp.float32),
        grid=(num_tiles,),
        in_specs=[
            pl.BlockSpec((TB, IN_CAT), lambda i: (i, 0)),   # streamed input
            const_spec((IN_CAT, NN_R)), const_spec((1, NN_R)),
            const_spec((NN_R, NN_R)), const_spec((1, NN_R)),
            const_spec((NN_R, NN_R)), const_spec((1, NN_R)),
            const_spec((NN_R, M_PAD)), const_spec((1, M_PAD)),
        ],
        out_specs=pl.BlockSpec((TB, M_PAD), lambda i: (i, 0)),
        compiler_params=pltpu.CompilerParams(
            dimension_semantics=("parallel",),   # megacore sharding on v7x
            vmem_limit_bytes=48 << 20,           # safe on v7x, headroom on v5e/v6e
        ),
    )(x, w1, b1, w2, b2, w3, b3, w4p, b4p)
    return out[:B, :M_OUT]


def init_params(key):
    """Deterministic synthetic parameters matching the PyTorch Linear shapes.

    Weights are stored as (in_features, out_features) (transpose of torch's
    (out, in) layout) so the kernel computes x @ W.  fc1/fc2/fc3 weights and
    biases are stored in bf16 (MXU fast path); fc4 master weights stay f32
    and are padded/cast in the wrapper.
    """
    keys = jax.random.split(key, 8)

    def linear(kw, kb, fan_in, fan_out, w_dtype, b_dtype):
        bound = fan_in ** -0.5
        w = jax.random.uniform(kw, (fan_in, fan_out), jnp.float32, -bound, bound)
        b = jax.random.uniform(kb, (1, fan_out), jnp.float32, -bound, bound)
        return w.astype(w_dtype), b.astype(b_dtype)

    w1, b1 = linear(keys[0], keys[1], IN_CAT, NN_R, jnp.bfloat16, jnp.bfloat16)
    w2, b2 = linear(keys[2], keys[3], NN_R, NN_R, jnp.bfloat16, jnp.bfloat16)
    w3, b3 = linear(keys[4], keys[5], NN_R, NN_R, jnp.bfloat16, jnp.bfloat16)
    w4, b4 = linear(keys[6], keys[7], NN_R, M_OUT, jnp.float32, jnp.float32)
    return (w1, b1, w2, b2, w3, b3, w4, b4)


def _reference_forward(in_message, in_channel, params):
    """Pure-JAX reference with the same mixed-precision recipe as the kernel."""
    w1, b1, w2, b2, w3, b3, w4, b4 = params
    x = jnp.concatenate([in_message, in_channel], axis=-1).astype(jnp.bfloat16)
    h = jnp.maximum(jnp.dot(x, w1, preferred_element_type=jnp.float32)
                    .astype(jnp.bfloat16) + b1, 0)
    h = jnp.maximum(jnp.dot(h, w2, preferred_element_type=jnp.float32)
                    .astype(jnp.bfloat16) + b2, 0)
    h = jnp.maximum(jnp.dot(h, w3, preferred_element_type=jnp.float32)
                    .astype(jnp.bfloat16) + b3, 0)
    logits = jnp.dot(h, w4.astype(jnp.bfloat16),
                     preferred_element_type=jnp.float32) + b4
    return jax.nn.log_softmax(logits, axis=-1)


if __name__ == "__main__":
    key = jax.random.PRNGKey(0)
    k_params, k_msg, k_chan = jax.random.split(key, 3)

    params = init_params(k_params)

    B = 8  # small batch
    in_message = jax.random.normal(k_msg, (B, IN_HALF), jnp.float32)
    in_channel = jax.random.normal(k_chan, (B, IN_HALF), jnp.float32)

    out = decoder_forward(in_message, in_channel, params)
    out = jax.block_until_ready(out)

    ref = _reference_forward(in_message, in_channel, params)
    assert out.shape == (B, M_OUT)
    assert not bool(jnp.any(jnp.isnan(out))), "NaNs in kernel output"
    assert jnp.allclose(out, ref, atol=3e-2, rtol=3e-2), "mismatch vs reference"

    print("KERNEL_OK")
</pallas_src>

<mosaic_0001>
module attributes {stable_mosaic.version = 11 : i64} {
  func.func @_decoder_kernel(%arg0: i32, %arg1: memref<16x8xbf16, #tpu.memory_space<vmem>>, %arg2: memref<8x512xbf16, #tpu.memory_space<vmem>>, %arg3: memref<1x512xbf16, #tpu.memory_space<vmem>>, %arg4: memref<512x512xbf16, #tpu.memory_space<vmem>>, %arg5: memref<1x512xbf16, #tpu.memory_space<vmem>>, %arg6: memref<512x512xbf16, #tpu.memory_space<vmem>>, %arg7: memref<1x512xbf16, #tpu.memory_space<vmem>>, %arg8: memref<512x128xbf16, #tpu.memory_space<vmem>>, %arg9: memref<1x128xf32, #tpu.memory_space<vmem>>, %arg10: memref<16x128xf32, #tpu.memory_space<vmem>>) attributes {dimension_semantics = [#tpu.dimension_semantics<parallel>], iteration_bounds = array<i64: 1>, scalar_prefetch = 0 : i64, scratch_operands = 0 : i64, tpu.core_type = #tpu.core_type<tc>, window_params = [{transform_indices = @transform_0, window_bounds = array<i64: 16, 8>}, {pipeline_mode = #tpu.pipeline_mode<synchronous>, transform_indices = @transform_1, window_bounds = array<i64: 8, 512>}, {pipeline_mode = #tpu.pipeline_mode<synchronous>, transform_indices = @transform_2, window_bounds = array<i64: 1, 512>}, {pipeline_mode = #tpu.pipeline_mode<synchronous>, transform_indices = @transform_3, window_bounds = array<i64: 512, 512>}, {pipeline_mode = #tpu.pipeline_mode<synchronous>, transform_indices = @transform_4, window_bounds = array<i64: 1, 512>}, {pipeline_mode = #tpu.pipeline_mode<synchronous>, transform_indices = @transform_5, window_bounds = array<i64: 512, 512>}, {pipeline_mode = #tpu.pipeline_mode<synchronous>, transform_indices = @transform_6, window_bounds = array<i64: 1, 512>}, {pipeline_mode = #tpu.pipeline_mode<synchronous>, transform_indices = @transform_7, window_bounds = array<i64: 512, 128>}, {pipeline_mode = #tpu.pipeline_mode<synchronous>, transform_indices = @transform_8, window_bounds = array<i64: 1, 128>}, {transform_indices = @transform_9, window_bounds = array<i64: 16, 128>}]} {
    %c0 = arith.constant 0 : index
    %c0_0 = arith.constant 0 : index
    %0 = vector.load %arg1[%c0, %c0_0] : memref<16x8xbf16, #tpu.memory_space<vmem>>, vector<16x8xbf16>
    %c0_1 = arith.constant 0 : index
    %c0_2 = arith.constant 0 : index
    %1 = vector.load %arg2[%c0_1, %c0_2] : memref<8x512xbf16, #tpu.memory_space<vmem>>, vector<8x512xbf16>
    %cst = arith.constant dense<0.000000e+00> : vector<16x512xf32>
    %2 = tpu.matmul %0, %1, %cst {dimension_numbers = #tpu.dot_dimension_numbers<[1], [0], [0], [1], [0, 0, 1, 1], [], []>} : vector<16x8xbf16>, vector<8x512xbf16>, vector<16x512xf32> -> vector<16x512xf32>
    %3 = arith.truncf %2 : vector<16x512xf32> to vector<16x512xbf16>
    %c0_3 = arith.constant 0 : index
    %c0_4 = arith.constant 0 : index
    %4 = vector.load %arg3[%c0_3, %c0_4] : memref<1x512xbf16, #tpu.memory_space<vmem>>, vector<1x512xbf16>
    %5 = vector.broadcast %4 : vector<1x512xbf16> to vector<16x512xbf16>
    %6 = arith.addf %3, %5 : vector<16x512xbf16>
    %cst_5 = arith.constant 0.000000e+00 : bf16
    %7 = vector.broadcast %cst_5 : bf16 to vector<16x512xbf16>
    %8 = arith.maximumf %6, %7 : vector<16x512xbf16>
    %c0_6 = arith.constant 0 : index
    %c0_7 = arith.constant 0 : index
    %9 = vector.load %arg4[%c0_6, %c0_7] : memref<512x512xbf16, #tpu.memory_space<vmem>>, vector<512x512xbf16>
    %cst_8 = arith.constant dense<0.000000e+00> : vector<16x512xf32>
    %10 = tpu.matmul %8, %9, %cst_8 {dimension_numbers = #tpu.dot_dimension_numbers<[1], [0], [0], [1], [0, 0, 1, 1], [], []>} : vector<16x512xbf16>, vector<512x512xbf16>, vector<16x512xf32> -> vector<16x512xf32>
    %11 = arith.truncf %10 : vector<16x512xf32> to vector<16x512xbf16>
    %c0_9 = arith.constant 0 : index
    %c0_10 = arith.constant 0 : index
    %12 = vector.load %arg5[%c0_9, %c0_10] : memref<1x512xbf16, #tpu.memory_space<vmem>>, vector<1x512xbf16>
    %13 = vector.broadcast %12 : vector<1x512xbf16> to vector<16x512xbf16>
    %14 = arith.addf %11, %13 : vector<16x512xbf16>
    %cst_11 = arith.constant 0.000000e+00 : bf16
    %15 = vector.broadcast %cst_11 : bf16 to vector<16x512xbf16>
    %16 = arith.maximumf %14, %15 : vector<16x512xbf16>
    %c0_12 = arith.constant 0 : index
    %c0_13 = arith.constant 0 : index
    %17 = vector.load %arg6[%c0_12, %c0_13] : memref<512x512xbf16, #tpu.memory_space<vmem>>, vector<512x512xbf16>
    %cst_14 = arith.constant dense<0.000000e+00> : vector<16x512xf32>
    %18 = tpu.matmul %16, %17, %cst_14 {dimension_numbers = #tpu.dot_dimension_numbers<[1], [0], [0], [1], [0, 0, 1, 1], [], []>} : vector<16x512xbf16>, vector<512x512xbf16>, vector<16x512xf32> -> vector<16x512xf32>
    %19 = arith.truncf %18 : vector<16x512xf32> to vector<16x512xbf16>
    %c0_15 = arith.constant 0 : index
    %c0_16 = arith.constant 0 : index
    %20 = vector.load %arg7[%c0_15, %c0_16] : memref<1x512xbf16, #tpu.memory_space<vmem>>, vector<1x512xbf16>
    %21 = vector.broadcast %20 : vector<1x512xbf16> to vector<16x512xbf16>
    %22 = arith.addf %19, %21 : vector<16x512xbf16>
    %cst_17 = arith.constant 0.000000e+00 : bf16
    %23 = vector.broadcast %cst_17 : bf16 to vector<16x512xbf16>
    %24 = arith.maximumf %22, %23 : vector<16x512xbf16>
    %c0_18 = arith.constant 0 : index
    %c0_19 = arith.constant 0 : index
    %25 = vector.load %arg8[%c0_18, %c0_19] : memref<512x128xbf16, #tpu.memory_space<vmem>>, vector<512x128xbf16>
    %cst_20 = arith.constant dense<0.000000e+00> : vector<16x128xf32>
    %26 = tpu.matmul %24, %25, %cst_20 {dimension_numbers = #tpu.dot_dimension_numbers<[1], [0], [0], [1], [0, 0, 1, 1], [], []>} : vector<16x512xbf16>, vector<512x128xbf16>, vector<16x128xf32> -> vector<16x128xf32>
    %c0_21 = arith.constant 0 : index
    %c0_22 = arith.constant 0 : index
    %27 = vector.load %arg9[%c0_21, %c0_22] : memref<1x128xf32, #tpu.memory_space<vmem>>, vector<1x128xf32>
    %28 = vector.broadcast %27 : vector<1x128xf32> to vector<16x128xf32>
    %29 = arith.addf %26, %28 : vector<16x128xf32>
    %cst_23 = arith.constant dense<0xFF800000> : vector<16xf32>
    %30 = vector.multi_reduction <maximumf>, %29, %cst_23 [1] : vector<16x128xf32> to vector<16xf32>
    %31 = vector.shape_cast %30 : vector<16xf32> to vector<16x1xf32>
    %32 = vector.broadcast %31 : vector<16x1xf32> to vector<16x128xf32>
    %33 = arith.subf %29, %32 : vector<16x128xf32>
    %34 = math.exp %33 : vector<16x128xf32>
    %cst_24 = arith.constant dense<0.000000e+00> : vector<16xf32>
    %35 = vector.multi_reduction <add>, %34, %cst_24 [1] : vector<16x128xf32> to vector<16xf32>
    %36 = vector.shape_cast %35 : vector<16xf32> to vector<16x1xf32>
    %37 = math.log %36 : vector<16x1xf32>
    %38 = vector.broadcast %37 : vector<16x1xf32> to vector<16x128xf32>
    %39 = arith.subf %33, %38 : vector<16x128xf32>
    %c0_25 = arith.constant 0 : index
    %c0_26 = arith.constant 0 : index
    %40 = vector.load %arg10[%c0_25, %c0_26] : memref<16x128xf32, #tpu.memory_space<vmem>>, vector<16x128xf32>
    tpu.vector_store %arg10[%c0_25, %c0_26], %39 {strides = array<i32>} : memref<16x128xf32, #tpu.memory_space<vmem>>, vector<16x128xf32>,
    return
  }
  func.func @transform_0(%arg0: i32) -> (i32, i32) {
    %c0_i32 = arith.constant 0 : i32
    %c0_i32_0 = arith.constant 0 : i32
    return %arg0, %c0_i32 : i32, i32
  }
  func.func @transform_1(%arg0: i32) -> (i32, i32) {
    %c0_i32 = arith.constant 0 : i32
    %c0_i32_0 = arith.constant 0 : i32
    %c0_i32_1 = arith.constant 0 : i32
    return %c0_i32, %c0_i32_0 : i32, i32
  }
  func.func @transform_2(%arg0: i32) -> (i32, i32) {
    %c0_i32 = arith.constant 0 : i32
    %c0_i32_0 = arith.constant 0 : i32
    %c0_i32_1 = arith.constant 0 : i32
    return %c0_i32, %c0_i32_0 : i32, i32
  }
  func.func @transform_3(%arg0: i32) -> (i32, i32) {
    %c0_i32 = arith.constant 0 : i32
    %c0_i32_0 = arith.constant 0 : i32
    %c0_i32_1 = arith.constant 0 : i32
    return %c0_i32, %c0_i32_0 : i32, i32
  }
  func.func @transform_4(%arg0: i32) -> (i32, i32) {
    %c0_i32 = arith.constant 0 : i32
    %c0_i32_0 = arith.constant 0 : i32
    %c0_i32_1 = arith.constant 0 : i32
    return %c0_i32, %c0_i32_0 : i32, i32
  }
  func.func @transform_5(%arg0: i32) -> (i32, i32) {
    %c0_i32 = arith.constant 0 : i32
    %c0_i32_0 = arith.constant 0 : i32
    %c0_i32_1 = arith.constant 0 : i32
    return %c0_i32, %c0_i32_0 : i32, i32
  }
  func.func @transform_6(%arg0: i32) -> (i32, i32) {
    %c0_i32 = arith.constant 0 : i32
    %c0_i32_0 = arith.constant 0 : i32
    %c0_i32_1 = arith.constant 0 : i32
    return %c0_i32, %c0_i32_0 : i32, i32
  }
  func.func @transform_7(%arg0: i32) -> (i32, i32) {
    %c0_i32 = arith.constant 0 : i32
    %c0_i32_0 = arith.constant 0 : i32
    %c0_i32_1 = arith.constant 0 : i32
    return %c0_i32, %c0_i32_0 : i32, i32
  }
  func.func @transform_8(%arg0: i32) -> (i32, i32) {
    %c0_i32 = arith.constant 0 : i32
    %c0_i32_0 = arith.constant 0 : i32
    %c0_i32_1 = arith.constant 0 : i32
    return %c0_i32, %c0_i32_0 : i32, i32
  }
  func.func @transform_9(%arg0: i32) -> (i32, i32) {
    %c0_i32 = arith.constant 0 : i32
    %c0_i32_0 = arith.constant 0 : i32
    return %arg0, %c0_i32 : i32, i32
  }
}

</mosaic_0001>

<bundles_post_ra>
// kernel: decoder_forward.1
= control target key start
LH: loop header
LB: loop body
LE: loop exit
PB: predicated region body
PF: predicated region fallthrough
CT: control target
= control target key end

     0   :  { %14 = vsyncpa [#allocation3], 0  ;;  %s3747_s0 = inlined_call_operand.vmem [shape: bf16[16,8], index: 0, kind: input, shape index: {}]   ;;  %s3748_s1 = inlined_call_operand.vmem [shape: bf16[8,512], index: 1, kind: input, shape index: {}]   ;;  %s3749_s2 = inlined_call_operand.vmem [shape: bf16[1,512], index: 2, kind: input, shape index: {}]   ;;  %s3750_s3 = inlined_call_operand.hbm [shape: bf16[512,512], index: 3, kind: input, shape index: {}]   ;;  %s3751_s4 = inlined_call_operand.vmem [shape: bf16[1,512], index: 4, kind: input, shape index: {}]   ;;  %s3752_s5 = inlined_call_operand.hbm [shape: bf16[512,512], index: 5, kind: input, shape index: {}]   ;;  %s3753_s6 = inlined_call_operand.vmem [shape: bf16[1,512], index: 6, kind: input, shape index: {}]   ;;  %s3754_s7 = inlined_call_operand.vmem [shape: bf16[512,128], index: 7, kind: input, shape index: {}]   ;;  %s3755_s8 = inlined_call_operand.vmem [shape: f32[1,128], index: 8, kind: input, shape index: {}]   ;;  %s3756_s9 = inlined_call_operand.vmem [shape: f32[16,128], index: 9, kind: output, shape index: {}]  }
   0x1   :  { %15 = vsyncpa [#allocation5], 0  ;;  %s3478_s30 = smov [#allocation2]   ;;  %s3430_s13 = scalar_lea.hbm %s3750_s3, 16384 }
   0x2   :  { %s27_s10 = sshll.u32 %s3478_s30, 4  ;;  %p3431_p0 = scmp.ne.s32.totalorder %s3750_s3, %s3430_s13  ;;  %s28_s10 = int_to_ptr.vmem [resolvable:$true] %s27_s10 }
   0x3   :  { %p3434_p1 = scmp.lt.u32.totalorder %s3430_s13, %s3750_s3 }
   0x5   :  { %p3436_p2 = pnand %p3434_p1, %p3431_p0 }
   0x7   :  { %3439 = shalt.err (!%p3436_p2)
}
   0x8   :  { %s3440_s18 = scalar_lea.vmem %s28_s10, 16384  ;;  %p3445_p4 = scmp.lt.s32.totalorder %s28_s10, %s28_s10 }
   0x9   :  { %p3441_p3 = scmp.ne.s32.totalorder %s28_s10, %s3440_s18  ;;  %p3446_p5 = scmp.lt.s32.totalorder %s3440_s18, %s3440_s18 }
   0xb   :  { %p3447_p6 = por %p3446_p5, %p3445_p4 }
   0xd   :  { %p3448_p7 = pnand %p3447_p6, %p3441_p3 }
   0xf   :  { %3451 = shalt.err (!%p3448_p7)
}
  0x10   :  { %s3479_s19 = smov 256   ;;  %s3480_s20 = smov 16  }
  0x11   :  { %33 = dma.hbm_to_vmem [thread:$0]  %s3750_s3, 16384, %s28_s10, [#allocation3], %s3479_s19, %s3479_s19, %s3480_s20  }
  0x12   :  { %s3481_s23 = smov [#allocation4]   ;;  %s3452_s27 = scalar_lea.hbm %s3752_s5, 16384 }
  0x13   :  { %s41_s24 = sshll.u32 %s3481_s23, 4  ;;  %p3453_p8 = scmp.ne.s32.totalorder %s3752_s5, %s3452_s27  ;;  %s42_s24 = int_to_ptr.vmem [resolvable:$true] %s41_s24 }
  0x14   :  { %p3456_p9 = scmp.lt.u32.totalorder %s3452_s27, %s3752_s5 }
  0x16   :  { %p3458_p10 = pnand %p3456_p9, %p3453_p8 }
  0x18   :  { %3461 = shalt.err (!%p3458_p10)
}
  0x19   :  { %s3462_s12 = scalar_lea.vmem %s42_s24, 16384  ;;  %p3467_p12 = scmp.lt.s32.totalorder %s42_s24, %s42_s24 }
  0x1a   :  { %p3463_p11 = scmp.ne.s32.totalorder %s42_s24, %s3462_s12  ;;  %p3468_p13 = scmp.lt.s32.totalorder %s3462_s12, %s3462_s12 }
  0x1c   :  { %p3469_p0 = por %p3468_p13, %p3467_p12 }
  0x1e   :  { %p3470_p1 = pnand %p3469_p0, %p3463_p11 }
  0x20   :  { %3473 = shalt.err (!%p3470_p1)
}
  0x21   :  { %47 = dma.hbm_to_vmem [thread:$0]  %s3752_s5, 16384, %s42_s24, [#allocation5], %s3479_s19, %s3479_s19, %s3480_s20  }
  0x22   :  { %3474 = dma.done.wait [#allocation3], 16384  }
  0x23   :  { %3475 = vsyncadd [#allocation3], 4294950912 }
  0x24   :  { %3476 = dma.done.wait [#allocation5], 16384  }
  0x25   :  { %3477 = vsyncadd [#allocation5], 4294950912  ;;  %v3482_v0 = vmov 0   ;;  %v63_v1 = vld [vmem:[%s3748_s1] sm:$0xff]  ;;  %vm84_vm0 = vcmask 1043456   ;;  %v64_v4 = vld [vmem:[%s3748_s1 + $0x8] sm:$0xff] }
  0x26   :  { %129 = vmatprep.mubr.bf16.mxu0 %v3482_v0  ;;  %172 = vmatprep.mubr.bf16.mxu1 %v3482_v0  ;;  %v2636_v2 = vcombine.high %v63_v1, %v63_v1  ;;  %v2635_v3 = vcombine.low %v63_v1, %v63_v1  ;;  %v3003_v5 = vld [vmem:[%s3747_s0] sm:$0xff]   ;;  %v2638_v6 = vcombine.high %v64_v4, %v64_v4  ;;  %vm80_vm1 = vcmask 64512   ;;  %v3011_v12 = vld [vmem:[#allocation2 + $0xc] ss:$16 sps:$4 sm:$0xff]   ;;  %v3009_v13 = vld [vmem:[#allocation2 + $0x8] ss:$16 sps:$4 sm:$0xff]  }
  0x27   :  { %v2637_v7 = vcombine.low %v64_v4, %v64_v4  ;;  %v3008_v8 = vld [vmem:[#allocation2 + $0x4] ss:$16 sps:$4 sm:$0xff]   ;;  %v3006_v10 = vld [vmem:[#allocation2] ss:$16 sps:$4 sm:$0xff]   ;;  %v3017_v15 = vld [vmem:[#allocation2 + $0x2c] ss:$16 sps:$4 sm:$0xff]  }
  0x28   :  { %2639 = vmatprep.subr.msk.bf16.mxu0 %vm84_vm0, %v2636_v2  ;;  %v86_v9 = vsel %vm84_vm0, %v2635_v3, 0  ;;  %2641 = vmatprep.subr.msk.bf16.mxu1 %vm84_vm0, %v2638_v6  ;;  %v3014_v14 = vld [vmem:[#allocation2 + $0x24] ss:$16 sps:$4 sm:$0xff]   ;;  %v3012_v16 = vld [vmem:[#allocation2 + $0x20] ss:$16 sps:$4 sm:$0xff]  }
  0x29   :  { %98 = vmatpush1.bf16.msra.mxu0 %v86_v9  ;;  %v92_v11 = vsel %vm84_vm0, %v2637_v7, 0  ;;  %v3015_v17 = vld [vmem:[#allocation2 + $0x28] ss:$16 sps:$4 sm:$0xff]   ;;  %v3020_v18 = vld [vmem:[#allocation2 + $0x44] ss:$16 sps:$4 sm:$0xff]  }
  0x2a   :  { %141 = vmatpush1.bf16.msra.mxu1 %v92_v11  ;;  %1017 = vmatprep.subr.bf16.mxu0 %v3008_v8  ;;  %v3023_v19 = vld [vmem:[#allocation2 + $0x4c] ss:$16 sps:$4 sm:$0xff]   ;;  %v3018_v20 = vld [vmem:[#allocation2 + $0x40] ss:$16 sps:$4 sm:$0xff]   ;;  %v3021_v21 = vld [vmem:[#allocation2 + $0x48] ss:$16 sps:$4 sm:$0xff]  }
  0x2b   :  { %1103 = vmatprep.subr.bf16.mxu1 %v3011_v12  ;;  %v3026_v22 = vld [vmem:[#allocation2 + $0x64] ss:$16 sps:$4 sm:$0xff]   ;;  %v3029_v23 = vld [vmem:[#allocation2 + $0x6c] ss:$16 sps:$4 sm:$0xff]   ;;  %v3024_v24 = vld [vmem:[#allocation2 + $0x60] ss:$16 sps:$4 sm:$0xff]  }
  0x2c   :  { %2640 = vmatmul.mubr.msk.bf16.vlgmr.msra.gmra.mrb[0].mxu0 %vm80_vm1, %v3003_v5  ;;  %v3027_v25 = vld [vmem:[#allocation2 + $0x68] ss:$16 sps:$4 sm:$0xff]   ;;  %v3032_v26 = vld [vmem:[#allocation2 + $0x84] ss:$16 sps:$4 sm:$0xff]   ;;  %v3035_v27 = vld [vmem:[#allocation2 + $0x8c] ss:$16 sps:$4 sm:$0xff]  }
  0x2d   :  { %2642 = vmatmul.mubr.msk.bf16.vlgmr.msra.gmra.mrb[0].mxu1 %vm80_vm1, %v3003_v5  ;;  %1018 = vmatpush1.bf16.msra.mxu0 %v3006_v10  ;;  %v3030_v28 = vld [vmem:[#allocation2 + $0x80] ss:$16 sps:$4 sm:$0xff]   ;;  %v3033_v29 = vld [vmem:[#allocation2 + $0x88] ss:$16 sps:$4 sm:$0xff]   ;;  %v3038_v30 = vld [vmem:[#allocation2 + $0xa4] ss:$16 sps:$4 sm:$0xff]  }
  0x2e   :  { %1104 = vmatpush1.bf16.msra.mxu1 %v3009_v13  ;;  %1019 = vmatprep.subr.bf16.mxu0 %v3014_v14  ;;  %v3041_v31 = vld [vmem:[#allocation2 + $0xac] ss:$16 sps:$4 sm:$0xff]   ;;  %v3036_v32 = vld [vmem:[#allocation2 + $0xa0] ss:$16 sps:$4 sm:$0xff]   ;;  %v3039_v33 = vld [vmem:[#allocation2 + $0xa8] ss:$16 sps:$4 sm:$0xff]  }
  0x2f   :  { %1105 = vmatprep.subr.bf16.mxu1 %v3017_v15  ;;  %v3044_v34 = vld [vmem:[#allocation2 + $0xc4] ss:$16 sps:$4 sm:$0xff]   ;;  %v3047_v35 = vld [vmem:[#allocation2 + $0xcc] ss:$16 sps:$4 sm:$0xff]   ;;  %v3042_v36 = vld [vmem:[#allocation2 + $0xc0] ss:$16 sps:$4 sm:$0xff]   ;;  %v200_v15 = vlaneseq }
  0x30   :  { %v3045_v37 = vld [vmem:[#allocation2 + $0xc8] ss:$16 sps:$4 sm:$0xff]   ;;  %v3050_v38 = vld [vmem:[#allocation2 + $0xe4] ss:$16 sps:$4 sm:$0xff]   ;;  %v3053_v39 = vld [vmem:[#allocation2 + $0xec] ss:$16 sps:$4 sm:$0xff]  }
  0x31   :  { %1020 = vmatpush1.bf16.msra.mxu0 %v3012_v16  ;;  %v3048_v40 = vld [vmem:[#allocation2 + $0xe0] ss:$16 sps:$4 sm:$0xff]   ;;  %v3051_v41 = vld [vmem:[#allocation2 + $0xe8] ss:$16 sps:$4 sm:$0xff]   ;;  %v3056_v42 = vld [vmem:[#allocation2 + $0x104] ss:$16 sps:$4 sm:$0xff]  }
  0x32   :  { %1106 = vmatpush1.bf16.msra.mxu1 %v3015_v17  ;;  %1021 = vmatprep.subr.bf16.mxu0 %v3020_v18  ;;  %v3059_v43 = vld [vmem:[#allocation2 + $0x10c] ss:$16 sps:$4 sm:$0xff]   ;;  %v3054_v44 = vld [vmem:[#allocation2 + $0x100] ss:$16 sps:$4 sm:$0xff]   ;;  %v3057_v45 = vld [vmem:[#allocation2 + $0x108] ss:$16 sps:$4 sm:$0xff]  }
  0x33   :  { %1107 = vmatprep.subr.bf16.mxu1 %v3023_v19  ;;  %v3062_v46 = vld [vmem:[#allocation2 + $0x124] ss:$16 sps:$4 sm:$0xff]   ;;  %v3060_v47 = vld [vmem:[#allocation2 + $0x120] ss:$16 sps:$4 sm:$0xff]   ;;  %v3065_v48 = vld [vmem:[#allocation2 + $0x12c] ss:$16 sps:$4 sm:$0xff]  }
  0x34   :  { %v3063_v49 = vld [vmem:[#allocation2 + $0x128] ss:$16 sps:$4 sm:$0xff]   ;;  %v3068_v50 = vld [vmem:[#allocation2 + $0x144] ss:$16 sps:$4 sm:$0xff]   ;;  %v3071_v51 = vld [vmem:[#allocation2 + $0x14c] ss:$16 sps:$4 sm:$0xff]  }
  0x35   :  { %1022 = vmatpush1.bf16.msra.mxu0 %v3018_v20  ;;  %v3066_v52 = vld [vmem:[#allocation2 + $0x140] ss:$16 sps:$4 sm:$0xff]   ;;  %v3069_v53 = vld [vmem:[#allocation2 + $0x148] ss:$16 sps:$4 sm:$0xff]   ;;  %v3074_v54 = vld [vmem:[#allocation2 + $0x164] ss:$16 sps:$4 sm:$0xff]  }
  0x36   :  { %1108 = vmatpush1.bf16.msra.mxu1 %v3021_v21  ;;  %1023 = vmatprep.subr.bf16.mxu0 %v3026_v22  ;;  %v3077_v55 = vld [vmem:[#allocation2 + $0x16c] ss:$16 sps:$4 sm:$0xff]   ;;  %v3072_v56 = vld [vmem:[#allocation2 + $0x160] ss:$16 sps:$4 sm:$0xff]   ;;  %v3075_v57 = vld [vmem:[#allocation2 + $0x168] ss:$16 sps:$4 sm:$0xff]  }
  0x37   :  { %1109 = vmatprep.subr.bf16.mxu1 %v3029_v23  ;;  %v3080_v58 = vld [vmem:[#allocation2 + $0x184] ss:$16 sps:$4 sm:$0xff]   ;;  %v3083_v59 = vld [vmem:[#allocation2 + $0x18c] ss:$16 sps:$4 sm:$0xff]   ;;  %v3078_v60 = vld [vmem:[#allocation2 + $0x180] ss:$16 sps:$4 sm:$0xff]  }
  0x38   :  { %v3081_v61 = vld [vmem:[#allocation2 + $0x188] ss:$16 sps:$4 sm:$0xff]   ;;  %v3086_v62 = vld [vmem:[#allocation2 + $0x1a4] ss:$16 sps:$4 sm:$0xff]   ;;  %v3089_v63 = vld [vmem:[#allocation2 + $0x1ac] ss:$16 sps:$4 sm:$0xff]  }
  0x39   :  { %1024 = vmatpush1.bf16.msra.mxu0 %v3024_v24  ;;  %v3084_v1 = vld [vmem:[#allocation2 + $0x1a0] ss:$16 sps:$4 sm:$0xff]   ;;  %v3087_v2 = vld [vmem:[#allocation2 + $0x1a8] ss:$16 sps:$4 sm:$0xff]   ;;  %v3092_v3 = vld [vmem:[#allocation2 + $0x1c4] ss:$16 sps:$4 sm:$0xff]  }
  0x3a   :  { %1110 = vmatpush1.bf16.msra.mxu1 %v3027_v25  ;;  %1025 = vmatprep.subr.bf16.mxu0 %v3032_v26  ;;  %v3095_v4 = vld [vmem:[#allocation2 + $0x1cc] ss:$16 sps:$4 sm:$0xff]   ;;  %v3090_v5 = vld [vmem:[#allocation2 + $0x1c0] ss:$16 sps:$4 sm:$0xff]   ;;  %v3093_v6 = vld [vmem:[#allocation2 + $0x1c8] ss:$16 sps:$4 sm:$0xff]  }
  0x3b   :  { %1111 = vmatprep.subr.bf16.mxu1 %v3035_v27  ;;  %v3098_v7 = vld [vmem:[#allocation2 + $0x1e4] ss:$16 sps:$4 sm:$0xff]   ;;  %v3101_v8 = vld [vmem:[#allocation2 + $0x1ec] ss:$16 sps:$4 sm:$0xff]   ;;  %v3096_v9 = vld [vmem:[#allocation2 + $0x1e0] ss:$16 sps:$4 sm:$0xff]  }
  0x3c   :  { %v3099_v10 = vld [vmem:[#allocation2 + $0x1e8] ss:$16 sps:$4 sm:$0xff]   ;;  %v3104_v11 = vld [vmem:[#allocation2 + $0x204] ss:$16 sps:$4 sm:$0xff]   ;;  %v3107_v12 = vld [vmem:[#allocation2 + $0x20c] ss:$16 sps:$4 sm:$0xff]  }
  0x3d   :  { %1026 = vmatpush1.bf16.msra.mxu0 %v3030_v28  ;;  %v3483_v13 = vmov 1966171168   ;;  %v201_v17 = vshrl.u32 %v200_v15, 7  ;;  %v3147_v15 = vld [vmem:[#allocation2 + $0x2e8] ss:$16 sps:$4 sm:$0xff]  }
  0x3e   :  { %1112 = vmatpush1.bf16.msra.mxu1 %v3033_v29  ;;  %1027 = vmatprep.subr.bf16.mxu0 %v3038_v30  ;;  %v198_v14 = vunpack.c.l.s4 %v3483_v13  ;;  %v2643_v18 = vld.sshfl [vmem:[%s3749_s2] sm:$0x33 pattern:$0x75316420]  ;;  %v3149_v13 = vld [vmem:[#allocation2 + $0x2ec] ss:$16 sps:$4 sm:$0xff]  }
  0x3f   :  { %1113 = vmatprep.subr.bf16.mxu1 %v3041_v31  ;;  %v196_v20 = vcombine.high %v2643_v18, %v2643_v18  ;;  %v3580_v25 = vsub.s32 0, %v201_v17 }
  0x40   :  { %v199_v16 = vunpack.c.0.s8 %v198_v14  ;;  %v3144_v14 = vld [vmem:[#allocation2 + $0x2e0] ss:$16 sps:$4 sm:$0xff]  }
  0x41   :  { %1028 = vmatpush1.bf16.msra.mxu0 %v3036_v32 }
  0x42   :  { %1114 = vmatpush1.bf16.msra.mxu1 %v3039_v33  ;;  %1029 = vmatprep.subr.bf16.mxu0 %v3044_v34  ;;  %v3572_v19 = vsub.s32 %v199_v16, %v201_v17  ;;  %v3152_v16 = vld [vmem:[#allocation2 + $0x304] ss:$16 sps:$4 sm:$0xff]   ;;  %v3155_v17 = vld [vmem:[#allocation2 + $0x30c] ss:$16 sps:$4 sm:$0xff]  }
  0x43   :  { %1115 = vmatprep.subr.bf16.mxu1 %v3047_v35 }
  0x44   :  { %v3575_v21 = vrot.slane %v2643_v18, %v3572_v19  ;;  %v210_v22 = vrot.slane %v196_v20, %v3572_v19  ;;  %v3150_v18 = vld [vmem:[#allocation2 + $0x300] ss:$16 sps:$4 sm:$0xff]   ;;  %v3153_v20 = vld [vmem:[#allocation2 + $0x308] ss:$16 sps:$4 sm:$0xff]  }
  0x45   :  { %1030 = vmatpush1.bf16.msra.mxu0 %v3042_v36 }
  0x46   :  { %1116 = vmatpush1.bf16.msra.mxu1 %v3045_v37  ;;  %1031 = vmatprep.subr.bf16.mxu0 %v3050_v38  ;;  %v212_v23 = vcombine.high %v210_v22, %v210_v22  ;;  %v214_v24 = vpack.i.b16 %v3575_v21, %v3575_v21  ;;  %v221_v26 = vpack.i.b16 %v210_v22, %v210_v22  ;;  %v3158_v22 = vld [vmem:[#allocation2 + $0x324] ss:$16 sps:$4 sm:$0xff]  }
  0x47   :  { %1117 = vmatprep.subr.bf16.mxu1 %v3053_v39 }
  0x48   :  { %v235_v27 = vpack.i.b16 %v212_v23, %v212_v23  ;;  %v219_v30 = vrot.slane %v214_v24, %v3580_v25  ;;  %v226_v33 = vrot.slane %v221_v26, %v3580_v25  ;;  %v3161_v23 = vld [vmem:[#allocation2 + $0x32c] ss:$16 sps:$4 sm:$0xff]   ;;  %v3156_v24 = vld [vmem:[#allocation2 + $0x320] ss:$16 sps:$4 sm:$0xff]   ;;  %v3159_v26 = vld [vmem:[#allocation2 + $0x328] ss:$16 sps:$4 sm:$0xff]  }
  0x49   :  { %1032 = vmatpush1.bf16.msra.mxu0 %v3048_v40 }
  0x4a   :  { %1118 = vmatpush1.bf16.msra.mxu1 %v3051_v41  ;;  %1033 = vmatprep.subr.bf16.mxu0 %v3056_v42  ;;  %v240_v38 = vrot.slane %v235_v27, %v3580_v25  ;;  %v3164_v27 = vld [vmem:[#allocation2 + $0x344] ss:$16 sps:$4 sm:$0xff]  }
  0x4b   :  { %1119 = vmatprep.subr.bf16.mxu1 %v3059_v43 }
  0x4d   :  { %1034 = vmatpush1.bf16.msra.mxu0 %v3054_v44 }
  0x4e   :  { %1120 = vmatpush1.bf16.msra.mxu1 %v3057_v45  ;;  %1035 = vmatprep.subr.bf16.mxu0 %v3062_v46 }
  0x4f   :  { %1121 = vmatprep.subr.bf16.mxu1 %v3065_v48  ;;  %v3105_v48 = vld [vmem:[#allocation2 + $0x208] ss:$16 sps:$4 sm:$0xff]  }
  0x51   :  { %1036 = vmatpush1.bf16.msra.mxu0 %v3060_v47  ;;  %v3102_v47 = vld [vmem:[#allocation2 + $0x200] ss:$16 sps:$4 sm:$0xff]  }
  0x52   :  { %1122 = vmatpush1.bf16.msra.mxu1 %v3063_v49  ;;  %1037 = vmatprep.subr.bf16.mxu0 %v3068_v50  ;;  %v3110_v50 = vld [vmem:[#allocation2 + $0x224] ss:$16 sps:$4 sm:$0xff]  }
  0x53   :  { %1123 = vmatprep.subr.bf16.mxu1 %v3071_v51  ;;  %v3113_v51 = vld [vmem:[#allocation2 + $0x22c] ss:$16 sps:$4 sm:$0xff]  }
  0x55   :  { %1038 = vmatpush1.bf16.msra.mxu0 %v3066_v52 }
  0x56   :  { %1124 = vmatpush1.bf16.msra.mxu1 %v3069_v53  ;;  %1039 = vmatprep.subr.bf16.mxu0 %v3074_v54  ;;  %v3108_v53 = vld [vmem:[#allocation2 + $0x220] ss:$16 sps:$4 sm:$0xff]   ;;  %v3111_v54 = vld [vmem:[#allocation2 + $0x228] ss:$16 sps:$4 sm:$0xff]  }
  0x57   :  { %1125 = vmatprep.subr.bf16.mxu1 %v3077_v55  ;;  %v3116_v55 = vld [vmem:[#allocation2 + $0x244] ss:$16 sps:$4 sm:$0xff]  }
  0x59   :  { %1040 = vmatpush1.bf16.msra.mxu0 %v3072_v56  ;;  %v3119_v56 = vld [vmem:[#allocation2 + $0x24c] ss:$16 sps:$4 sm:$0xff]  }
  0x5a   :  { %1126 = vmatpush1.bf16.msra.mxu1 %v3075_v57  ;;  %1041 = vmatprep.subr.bf16.mxu0 %v3080_v58  ;;  %v3114_v57 = vld [vmem:[#allocation2 + $0x240] ss:$16 sps:$4 sm:$0xff]   ;;  %v3117_v58 = vld [vmem:[#allocation2 + $0x248] ss:$16 sps:$4 sm:$0xff]  }
  0x5b   :  { %1127 = vmatprep.subr.bf16.mxu1 %v3083_v59  ;;  %v3122_v59 = vld [vmem:[#allocation2 + $0x264] ss:$16 sps:$4 sm:$0xff]  }
  0x5d   :  { %1042 = vmatpush1.bf16.msra.mxu0 %v3078_v60  ;;  %v3125_v60 = vld [vmem:[#allocation2 + $0x26c] ss:$16 sps:$4 sm:$0xff]  }
  0x5e   :  { %1128 = vmatpush1.bf16.msra.mxu1 %v3081_v61  ;;  %1043 = vmatprep.subr.bf16.mxu0 %v3086_v62  ;;  %v3120_v61 = vld [vmem:[#allocation2 + $0x260] ss:$16 sps:$4 sm:$0xff]   ;;  %v3123_v62 = vld [vmem:[#allocation2 + $0x268] ss:$16 sps:$4 sm:$0xff]  }
  0x5f   :  { %1129 = vmatprep.subr.bf16.mxu1 %v3089_v63  ;;  %v3128_v63 = vld [vmem:[#allocation2 + $0x284] ss:$16 sps:$4 sm:$0xff]  }
  0x61   :  { %1044 = vmatpush1.bf16.msra.mxu0 %v3084_v1  ;;  %v3131_v1 = vld [vmem:[#allocation2 + $0x28c] ss:$16 sps:$4 sm:$0xff]  }
  0x62   :  { %1130 = vmatpush1.bf16.msra.mxu1 %v3087_v2  ;;  %1045 = vmatprep.subr.bf16.mxu0 %v3092_v3  ;;  %v3126_v2 = vld [vmem:[#allocation2 + $0x280] ss:$16 sps:$4 sm:$0xff]   ;;  %v3129_v3 = vld [vmem:[#allocation2 + $0x288] ss:$16 sps:$4 sm:$0xff]  }
  0x63   :  { %1131 = vmatprep.subr.bf16.mxu1 %v3095_v4  ;;  %v3134_v4 = vld [vmem:[#allocation2 + $0x2a4] ss:$16 sps:$4 sm:$0xff]  }
  0x65   :  { %1046 = vmatpush1.bf16.msra.mxu0 %v3090_v5  ;;  %v3137_v5 = vld [vmem:[#allocation2 + $0x2ac] ss:$16 sps:$4 sm:$0xff]  }
  0x66   :  { %1132 = vmatpush1.bf16.msra.mxu1 %v3093_v6  ;;  %1047 = vmatprep.subr.bf16.mxu0 %v3098_v7  ;;  %v3132_v6 = vld [vmem:[#allocation2 + $0x2a0] ss:$16 sps:$4 sm:$0xff]   ;;  %v3135_v7 = vld [vmem:[#allocation2 + $0x2a8] ss:$16 sps:$4 sm:$0xff]  }
  0x67   :  { %1133 = vmatprep.subr.bf16.mxu1 %v3101_v8  ;;  %v3140_v8 = vld [vmem:[#allocation2 + $0x2c4] ss:$16 sps:$4 sm:$0xff]  }
  0x69   :  { %1048 = vmatpush1.bf16.msra.mxu0 %v3096_v9  ;;  %v3143_v9 = vld [vmem:[#allocation2 + $0x2cc] ss:$16 sps:$4 sm:$0xff]  }
  0x6a   :  { %1134 = vmatpush1.bf16.msra.mxu1 %v3099_v10  ;;  %1060 = vmatprep.subr.bf16.mxu0 %v3104_v11  ;;  %v3138_v10 = vld [vmem:[#allocation2 + $0x2c0] ss:$16 sps:$4 sm:$0xff]   ;;  %v3141_v11 = vld [vmem:[#allocation2 + $0x2c8] ss:$16 sps:$4 sm:$0xff]  }
  0x6b   :  { %1146 = vmatprep.subr.bf16.mxu1 %v3107_v12  ;;  %v3146_v12 = vld [vmem:[#allocation2 + $0x2e4] ss:$16 sps:$4 sm:$0xff]  }
  0xff   :  { %v131_v28 = vpop.f32.mrb[0].mxu0 }
 0x100   :  { %v133_v29 = vpop.f32.mrb[1].mxu0  ;;  %v3583_v31 = vpop.f32.mrb[0].mxu1 }
 0x101   :  { %v135_v32 = vpop.f32.mrb[2].mxu0  ;;  %v176_v34 = vpop.f32.mrb[1].mxu1 }
 0x102   :  { %v183_v35 = vpack.c.bf16 %v135_v32, %v131_v28  ;;  %v137_v36 = vpop.f32.mrb[3].mxu0  ;;  %v3586_v37 = vpop.f32.mrb[2].mxu1  ;;  %v3167_v28 = vld [vmem:[#allocation2 + $0x34c] ss:$16 sps:$4 sm:$0xff]   ;;  %v3170_v32 = vld [vmem:[#allocation2 + $0x364] ss:$16 sps:$4 sm:$0xff]  }
 0x103   :  { %v184_v39 = vpack.c.bf16 %v137_v36, %v133_v29  ;;  %v185_v40 = vpack.c.bf16 %v3586_v37, %v3583_v31  ;;  %v180_v41 = vpop.f32.mrb[3].mxu1  ;;  %v3162_v29 = vld [vmem:[#allocation2 + $0x340] ss:$16 sps:$4 sm:$0xff]   ;;  %v3176_v36 = vld [vmem:[#allocation2 + $0x384] ss:$16 sps:$4 sm:$0xff]  }
 0x104   :  { %v241_v42 = vadd.bf16 %v219_v30, %v183_v35  ;;  %v186_v43 = vpack.c.bf16 %v180_v41, %v176_v34  ;;  %v3165_v30 = vld [vmem:[#allocation2 + $0x348] ss:$16 sps:$4 sm:$0xff]   ;;  %v3168_v34 = vld [vmem:[#allocation2 + $0x360] ss:$16 sps:$4 sm:$0xff]  }
 0x105   :  { %v242_v44 = vadd.bf16 %v226_v33, %v184_v39  ;;  %v3173_v33 = vld [vmem:[#allocation2 + $0x36c] ss:$16 sps:$4 sm:$0xff]   ;;  %v3171_v35 = vld [vmem:[#allocation2 + $0x368] ss:$16 sps:$4 sm:$0xff]   ;;  %v3174_v39 = vld [vmem:[#allocation2 + $0x380] ss:$16 sps:$4 sm:$0xff]  }
 0x106   :  { %v244_v45 = vadd.bf16 %v240_v38, %v186_v43  ;;  %v245_v49 = vmax.bf16 %v3482_v0, %v241_v42  ;;  %v3179_v38 = vld [vmem:[#allocation2 + $0x38c] ss:$16 sps:$4 sm:$0xff]   ;;  %v3177_v41 = vld [vmem:[#allocation2 + $0x388] ss:$16 sps:$4 sm:$0xff]   ;;  %v211_v42 = vcombine.high %v3575_v21, %v3575_v21  ;;  %v3182_v43 = vld [vmem:[#allocation2 + $0x3a4] ss:$16 sps:$4 sm:$0xff]  }
 0x107   :  { %v246_v46 = vmax.bf16 %v3482_v0, %v242_v44  ;;  %v3185_v44 = vld [vmem:[#allocation2 + $0x3ac] ss:$16 sps:$4 sm:$0xff]   ;;  %v3194_v21 = vld [vmem:[#allocation2 + $0x3e4] ss:$16 sps:$4 sm:$0xff]   ;;  %v3204_v31 = vld [vmem:[#allocation4 + $0x20] ss:$16 sps:$4 sm:$0xff]  }
 0x108   :  { %v248_v52 = vmax.bf16 %v3482_v0, %v244_v45  ;;  %v3180_v45 = vld [vmem:[#allocation2 + $0x3a0] ss:$16 sps:$4 sm:$0xff]   ;;  %v3207_v37 = vld [vmem:[#allocation4 + $0x28] ss:$16 sps:$4 sm:$0xff]  }
 0x109   :  { %1049 = vmatprep.mubr.bf16.mxu0 %v246_v46  ;;  %1135 = vmatprep.mubr.bf16.mxu1 %v246_v46  ;;  %v3183_v46 = vld [vmem:[#allocation2 + $0x3a8] ss:$16 sps:$4 sm:$0xff]  }
 0x10a   :  { %1050 = vmatmul.mubr.bf16.vlgmr.msra.gmra.mrb[4].mxu0 %v245_v49  ;;  %1136 = vmatmul.mubr.bf16.vlgmr.msra.gmra.mrb[4].mxu1 %v245_v49  ;;  %v3191_v49 = vld [vmem:[#allocation2 + $0x3cc] ss:$16 sps:$4 sm:$0xff]  }
 0x10b   :  { %1061 = vmatpush1.bf16.msra.mxu0 %v3102_v47  ;;  %1147 = vmatpush1.bf16.msra.mxu1 %v3105_v48  ;;  %v228_v47 = vpack.i.b16 %v211_v42, %v211_v42  ;;  %v3188_v48 = vld [vmem:[#allocation2 + $0x3c4] ss:$16 sps:$4 sm:$0xff]  }
 0x10c   :  { %1062 = vmatprep.subr.bf16.mxu0 %v3110_v50  ;;  %1148 = vmatprep.subr.bf16.mxu1 %v3113_v51  ;;  %v3186_v50 = vld [vmem:[#allocation2 + $0x3c0] ss:$16 sps:$4 sm:$0xff]   ;;  %v3189_v51 = vld [vmem:[#allocation2 + $0x3c8] ss:$16 sps:$4 sm:$0xff]   ;;  %v3266_v42 = vld [vmem:[#allocation4 + $0x164] ss:$16 sps:$4 sm:$0xff]  }
 0x10d   :  { %1092 = vmatprep.mubr.bf16.mxu0 %v248_v52  ;;  %1178 = vmatprep.mubr.bf16.mxu1 %v248_v52  ;;  %v233_v52 = vrot.slane %v228_v47, %v3580_v25  ;;  %v3275_v47 = vld [vmem:[#allocation4 + $0x18c] ss:$16 sps:$4 sm:$0xff]  }
 0x10f   :  { %1063 = vmatpush1.bf16.msra.mxu0 %v3108_v53  ;;  %1149 = vmatpush1.bf16.msra.mxu1 %v3111_v54  ;;  %v3197_v53 = vld [vmem:[#allocation2 + $0x3ec] ss:$16 sps:$4 sm:$0xff]   ;;  %v3192_v54 = vld [vmem:[#allocation2 + $0x3e0] ss:$16 sps:$4 sm:$0xff]  }
 0x110   :  { %1064 = vmatprep.subr.bf16.mxu0 %v3116_v55  ;;  %1150 = vmatprep.subr.bf16.mxu1 %v3119_v56  ;;  %v3195_v55 = vld [vmem:[#allocation2 + $0x3e8] ss:$16 sps:$4 sm:$0xff]   ;;  %v243_v56 = vadd.bf16 %v233_v52, %v185_v40  ;;  %v3212_v40 = vld [vmem:[#allocation4 + $0x44] ss:$16 sps:$4 sm:$0xff]   ;;  %v3276_v52 = vld [vmem:[#allocation4 + $0x1a0] ss:$16 sps:$4 sm:$0xff]  }
 0x113   :  { %1065 = vmatpush1.bf16.msra.mxu0 %v3114_v57  ;;  %1151 = vmatpush1.bf16.msra.mxu1 %v3117_v58  ;;  %v3200_v57 = vld [vmem:[#allocation4 + $0x4] ss:$16 sps:$4 sm:$0xff]   ;;  %v3203_v58 = vld [vmem:[#allocation4 + $0xc] ss:$16 sps:$4 sm:$0xff]  }
 0x114   :  { %1066 = vmatprep.subr.bf16.mxu0 %v3122_v59  ;;  %1152 = vmatprep.subr.bf16.mxu1 %v3125_v60  ;;  %v3198_v59 = vld [vmem:[#allocation4] ss:$16 sps:$4 sm:$0xff]   ;;  %v3201_v60 = vld [vmem:[#allocation4 + $0x8] ss:$16 sps:$4 sm:$0xff]  }
 0x117   :  { %1067 = vmatpush1.bf16.msra.mxu0 %v3120_v61  ;;  %1153 = vmatpush1.bf16.msra.mxu1 %v3123_v62  ;;  %v247_v61 = vmax.bf16 %v3482_v0, %v243_v56  ;;  %v3206_v62 = vld [vmem:[#allocation4 + $0x24] ss:$16 sps:$4 sm:$0xff]   ;;  %v3285_v56 = vld [vmem:[#allocation4 + $0x1c8] ss:$16 sps:$4 sm:$0xff]  }
 0x118   :  { %1068 = vmatprep.subr.bf16.mxu0 %v3128_v63  ;;  %1154 = vmatprep.subr.bf16.mxu1 %v3131_v1  ;;  %v3209_v63 = vld [vmem:[#allocation4 + $0x2c] ss:$16 sps:$4 sm:$0xff]  }
 0x119   :  { %v3215_v1 = vld [vmem:[#allocation4 + $0x4c] ss:$16 sps:$4 sm:$0xff]  }
 0x11b   :  { %1069 = vmatpush1.bf16.msra.mxu0 %v3126_v2  ;;  %1155 = vmatpush1.bf16.msra.mxu1 %v3129_v3  ;;  %v3210_v2 = vld [vmem:[#allocation4 + $0x40] ss:$16 sps:$4 sm:$0xff]   ;;  %v3213_v3 = vld [vmem:[#allocation4 + $0x48] ss:$16 sps:$4 sm:$0xff]  }
 0x11c   :  { %1070 = vmatprep.subr.bf16.mxu0 %v3134_v4  ;;  %1156 = vmatprep.subr.bf16.mxu1 %v3137_v5  ;;  %v3218_v4 = vld [vmem:[#allocation4 + $0x64] ss:$16 sps:$4 sm:$0xff]   ;;  %v3221_v5 = vld [vmem:[#allocation4 + $0x6c] ss:$16 sps:$4 sm:$0xff]  }
 0x11f   :  { %1071 = vmatpush1.bf16.msra.mxu0 %v3132_v6  ;;  %1157 = vmatpush1.bf16.msra.mxu1 %v3135_v7  ;;  %v3216_v6 = vld [vmem:[#allocation4 + $0x60] ss:$16 sps:$4 sm:$0xff]   ;;  %v3219_v7 = vld [vmem:[#allocation4 + $0x68] ss:$16 sps:$4 sm:$0xff]  }
 0x120   :  { %1072 = vmatprep.subr.bf16.mxu0 %v3140_v8  ;;  %1158 = vmatprep.subr.bf16.mxu1 %v3143_v9  ;;  %v3224_v8 = vld [vmem:[#allocation4 + $0x84] ss:$16 sps:$4 sm:$0xff]   ;;  %v3227_v9 = vld [vmem:[#allocation4 + $0x8c] ss:$16 sps:$4 sm:$0xff]  }
 0x123   :  { %1073 = vmatpush1.bf16.msra.mxu0 %v3138_v10  ;;  %1159 = vmatpush1.bf16.msra.mxu1 %v3141_v11  ;;  %v3222_v10 = vld [vmem:[#allocation4 + $0x80] ss:$16 sps:$4 sm:$0xff]   ;;  %v3225_v11 = vld [vmem:[#allocation4 + $0x88] ss:$16 sps:$4 sm:$0xff]  }
 0x124   :  { %1074 = vmatprep.subr.bf16.mxu0 %v3146_v12  ;;  %1160 = vmatprep.subr.bf16.mxu1 %v3149_v13  ;;  %v3230_v12 = vld [vmem:[#allocation4 + $0xa4] ss:$16 sps:$4 sm:$0xff]   ;;  %v3233_v13 = vld [vmem:[#allocation4 + $0xac] ss:$16 sps:$4 sm:$0xff]  }
 0x127   :  { %1075 = vmatpush1.bf16.msra.mxu0 %v3144_v14  ;;  %1161 = vmatpush1.bf16.msra.mxu1 %v3147_v15  ;;  %v3228_v14 = vld [vmem:[#allocation4 + $0xa0] ss:$16 sps:$4 sm:$0xff]   ;;  %v3231_v15 = vld [vmem:[#allocation4 + $0xa8] ss:$16 sps:$4 sm:$0xff]  }
 0x128   :  { %1076 = vmatprep.subr.bf16.mxu0 %v3152_v16  ;;  %1162 = vmatprep.subr.bf16.mxu1 %v3155_v17  ;;  %v3236_v16 = vld [vmem:[#allocation4 + $0xc4] ss:$16 sps:$4 sm:$0xff]   ;;  %v3239_v17 = vld [vmem:[#allocation4 + $0xcc] ss:$16 sps:$4 sm:$0xff]  }
 0x12b   :  { %1077 = vmatpush1.bf16.msra.mxu0 %v3150_v18  ;;  %1163 = vmatpush1.bf16.msra.mxu1 %v3153_v20  ;;  %v3234_v18 = vld [vmem:[#allocation4 + $0xc0] ss:$16 sps:$4 sm:$0xff]   ;;  %v3237_v20 = vld [vmem:[#allocation4 + $0xc8] ss:$16 sps:$4 sm:$0xff]  }
 0x12c   :  { %1078 = vmatprep.subr.bf16.mxu0 %v3158_v22  ;;  %1164 = vmatprep.subr.bf16.mxu1 %v3161_v23  ;;  %v3242_v22 = vld [vmem:[#allocation4 + $0xe4] ss:$16 sps:$4 sm:$0xff]   ;;  %v3245_v23 = vld [vmem:[#allocation4 + $0xec] ss:$16 sps:$4 sm:$0xff]  }
 0x12f   :  { %1079 = vmatpush1.bf16.msra.mxu0 %v3156_v24  ;;  %1165 = vmatpush1.bf16.msra.mxu1 %v3159_v26  ;;  %v3240_v24 = vld [vmem:[#allocation4 + $0xe0] ss:$16 sps:$4 sm:$0xff]   ;;  %v3243_v26 = vld [vmem:[#allocation4 + $0xe8] ss:$16 sps:$4 sm:$0xff]  }
 0x130   :  { %1080 = vmatprep.subr.bf16.mxu0 %v3164_v27  ;;  %1166 = vmatprep.subr.bf16.mxu1 %v3167_v28  ;;  %v3248_v27 = vld [vmem:[#allocation4 + $0x104] ss:$16 sps:$4 sm:$0xff]   ;;  %v3251_v28 = vld [vmem:[#allocation4 + $0x10c] ss:$16 sps:$4 sm:$0xff]  }
 0x133   :  { %1081 = vmatpush1.bf16.msra.mxu0 %v3162_v29  ;;  %1167 = vmatpush1.bf16.msra.mxu1 %v3165_v30  ;;  %v3246_v29 = vld [vmem:[#allocation4 + $0x100] ss:$16 sps:$4 sm:$0xff]   ;;  %v3249_v30 = vld [vmem:[#allocation4 + $0x108] ss:$16 sps:$4 sm:$0xff]  }
 0x134   :  { %1082 = vmatprep.subr.bf16.mxu0 %v3170_v32  ;;  %1168 = vmatprep.subr.bf16.mxu1 %v3173_v33  ;;  %v3254_v32 = vld [vmem:[#allocation4 + $0x124] ss:$16 sps:$4 sm:$0xff]   ;;  %v3257_v33 = vld [vmem:[#allocation4 + $0x12c] ss:$16 sps:$4 sm:$0xff]  }
 0x137   :  { %1083 = vmatpush1.bf16.msra.mxu0 %v3168_v34  ;;  %1169 = vmatpush1.bf16.msra.mxu1 %v3171_v35  ;;  %v3252_v34 = vld [vmem:[#allocation4 + $0x120] ss:$16 sps:$4 sm:$0xff]   ;;  %v3255_v35 = vld [vmem:[#allocation4 + $0x128] ss:$16 sps:$4 sm:$0xff]  }
 0x138   :  { %1084 = vmatprep.subr.bf16.mxu0 %v3176_v36  ;;  %1170 = vmatprep.subr.bf16.mxu1 %v3179_v38  ;;  %v3260_v36 = vld [vmem:[#allocation4 + $0x144] ss:$16 sps:$4 sm:$0xff]   ;;  %v3263_v38 = vld [vmem:[#allocation4 + $0x14c] ss:$16 sps:$4 sm:$0xff]  }
 0x13b   :  { %1085 = vmatpush1.bf16.msra.mxu0 %v3174_v39  ;;  %1171 = vmatpush1.bf16.msra.mxu1 %v3177_v41  ;;  %v3258_v39 = vld [vmem:[#allocation4 + $0x140] ss:$16 sps:$4 sm:$0xff]   ;;  %v3261_v41 = vld [vmem:[#allocation4 + $0x148] ss:$16 sps:$4 sm:$0xff]  }
 0x13c   :  { %1086 = vmatprep.subr.bf16.mxu0 %v3182_v43  ;;  %1172 = vmatprep.subr.bf16.mxu1 %v3185_v44  ;;  %v3269_v43 = vld [vmem:[#allocation4 + $0x16c] ss:$16 sps:$4 sm:$0xff]   ;;  %v3264_v44 = vld [vmem:[#allocation4 + $0x160] ss:$16 sps:$4 sm:$0xff]  }
 0x13f   :  { %1087 = vmatpush1.bf16.msra.mxu0 %v3180_v45  ;;  %1173 = vmatpush1.bf16.msra.mxu1 %v3183_v46  ;;  %v3267_v45 = vld [vmem:[#allocation4 + $0x168] ss:$16 sps:$4 sm:$0xff]   ;;  %v3272_v46 = vld [vmem:[#allocation4 + $0x184] ss:$16 sps:$4 sm:$0xff]  }
 0x140   :  { %1088 = vmatprep.subr.bf16.mxu0 %v3188_v48  ;;  %1174 = vmatprep.subr.bf16.mxu1 %v3191_v49  ;;  %v3270_v48 = vld [vmem:[#allocation4 + $0x180] ss:$16 sps:$4 sm:$0xff]   ;;  %v3273_v49 = vld [vmem:[#allocation4 + $0x188] ss:$16 sps:$4 sm:$0xff]  }
 0x143   :  { %1089 = vmatpush1.bf16.msra.mxu0 %v3186_v50  ;;  %1175 = vmatpush1.bf16.msra.mxu1 %v3189_v51  ;;  %v3278_v50 = vld [vmem:[#allocation4 + $0x1a4] ss:$16 sps:$4 sm:$0xff]   ;;  %v3281_v51 = vld [vmem:[#allocation4 + $0x1ac] ss:$16 sps:$4 sm:$0xff]  }
 0x144   :  { %1090 = vmatprep.subr.bf16.mxu0 %v3194_v21  ;;  %1176 = vmatprep.subr.bf16.mxu1 %v3197_v53  ;;  %v3279_v21 = vld [vmem:[#allocation4 + $0x1a8] ss:$16 sps:$4 sm:$0xff]   ;;  %v3284_v53 = vld [vmem:[#allocation4 + $0x1c4] ss:$16 sps:$4 sm:$0xff]  }
 0x147   :  { %1091 = vmatpush1.bf16.msra.mxu0 %v3192_v54  ;;  %1177 = vmatpush1.bf16.msra.mxu1 %v3195_v55  ;;  %v3287_v54 = vld [vmem:[#allocation4 + $0x1cc] ss:$16 sps:$4 sm:$0xff]   ;;  %v3282_v55 = vld [vmem:[#allocation4 + $0x1c0] ss:$16 sps:$4 sm:$0xff]  }
 0x148   :  { %2023 = vmatprep.subr.bf16.mxu0 %v3200_v57  ;;  %2109 = vmatprep.subr.bf16.mxu1 %v3203_v58  ;;  %v3290_v57 = vld [vmem:[#allocation4 + $0x1e4] ss:$16 sps:$4 sm:$0xff]   ;;  %v3293_v58 = vld [vmem:[#allocation4 + $0x1ec] ss:$16 sps:$4 sm:$0xff]  }
 0x14a   :  { %1093 = vmatmul.mubr.bf16.vlgmr.msra.gmra.mrb[4].mxu0 %v247_v61  ;;  %1179 = vmatmul.mubr.bf16.vlgmr.msra.gmra.mrb[4].mxu1 %v247_v61  ;;  %v3296_v61 = vld [vmem:[#allocation4 + $0x204] ss:$16 sps:$4 sm:$0xff]  }
 0x14b   :  { %2024 = vmatpush1.bf16.msra.mxu0 %v3198_v59  ;;  %2110 = vmatpush1.bf16.msra.mxu1 %v3201_v60  ;;  %v3288_v59 = vld [vmem:[#allocation4 + $0x1e0] ss:$16 sps:$4 sm:$0xff]   ;;  %v3291_v60 = vld [vmem:[#allocation4 + $0x1e8] ss:$16 sps:$4 sm:$0xff]  }
 0x14c   :  { %2025 = vmatprep.subr.bf16.mxu0 %v3206_v62  ;;  %2111 = vmatprep.subr.bf16.mxu1 %v3209_v63  ;;  %v3299_v62 = vld [vmem:[#allocation4 + $0x20c] ss:$16 sps:$4 sm:$0xff]   ;;  %v2772_v63 = vld.sshfl [vmem:[%s3751_s4] sm:$0x33 pattern:$0x75316420] }
 0x14f   :  { %2026 = vmatpush1.bf16.msra.mxu0 %v3204_v31  ;;  %2112 = vmatpush1.bf16.msra.mxu1 %v3207_v37  ;;  %v1202_v31 = vcombine.high %v2772_v63, %v2772_v63 }
 0x150   :  { %2027 = vmatprep.subr.bf16.mxu0 %v3212_v40  ;;  %2113 = vmatprep.subr.bf16.mxu1 %v3215_v1  ;;  %v3606_v40 = vrot.slane %v2772_v63, %v3572_v19  ;;  %v3342_v63 = vld [vmem:[#allocation4 + $0x300] ss:$16 sps:$4 sm:$0xff]  }
 0x151   :  { %v1216_v37 = vrot.slane %v1202_v31, %v3572_v19  ;;  %v3345_v31 = vld [vmem:[#allocation4 + $0x308] ss:$16 sps:$4 sm:$0xff]  }
 0x153   :  { %2028 = vmatpush1.bf16.msra.mxu0 %v3210_v2  ;;  %2114 = vmatpush1.bf16.msra.mxu1 %v3213_v3  ;;  %v1218_v1 = vcombine.high %v1216_v37, %v1216_v37  ;;  %v1220_v2 = vpack.i.b16 %v3606_v40, %v3606_v40  ;;  %v1227_v3 = vpack.i.b16 %v1216_v37, %v1216_v37  ;;  %v3350_v37 = vld [vmem:[#allocation4 + $0x324] ss:$16 sps:$4 sm:$0xff]  }
 0x154   :  { %2029 = vmatprep.subr.bf16.mxu0 %v3218_v4  ;;  %2115 = vmatprep.subr.bf16.mxu1 %v3221_v5 }
 0x155   :  { %v1241_v4 = vpack.i.b16 %v1218_v1, %v1218_v1  ;;  %v3353_v1 = vld [vmem:[#allocation4 + $0x32c] ss:$16 sps:$4 sm:$0xff]  }
 0x157   :  { %2030 = vmatpush1.bf16.msra.mxu0 %v3216_v6  ;;  %2116 = vmatpush1.bf16.msra.mxu1 %v3219_v7 }
 0x158   :  { %2031 = vmatprep.subr.bf16.mxu0 %v3224_v8  ;;  %2117 = vmatprep.subr.bf16.mxu1 %v3227_v9  ;;  %v1225_v9 = vrot.slane %v1220_v2, %v3580_v25  ;;  %v3348_v2 = vld [vmem:[#allocation4 + $0x320] ss:$16 sps:$4 sm:$0xff]  }
 0x15b   :  { %2032 = vmatpush1.bf16.msra.mxu0 %v3222_v10  ;;  %2118 = vmatpush1.bf16.msra.mxu1 %v3225_v11 }
 0x15c   :  { %2033 = vmatprep.subr.bf16.mxu0 %v3230_v12  ;;  %2119 = vmatprep.subr.bf16.mxu1 %v3233_v13  ;;  %v1232_v12 = vrot.slane %v1227_v3, %v3580_v25  ;;  %v3351_v3 = vld [vmem:[#allocation4 + $0x328] ss:$16 sps:$4 sm:$0xff]  }
 0x15f   :  { %2034 = vmatpush1.bf16.msra.mxu0 %v3228_v14  ;;  %2120 = vmatpush1.bf16.msra.mxu1 %v3231_v15 }
 0x160   :  { %2035 = vmatprep.subr.bf16.mxu0 %v3236_v16  ;;  %2121 = vmatprep.subr.bf16.mxu1 %v3239_v17  ;;  %v1246_v17 = vrot.slane %v1241_v4, %v3580_v25  ;;  %v3356_v4 = vld [vmem:[#allocation4 + $0x344] ss:$16 sps:$4 sm:$0xff]  }
 0x163   :  { %2036 = vmatpush1.bf16.msra.mxu0 %v3234_v18  ;;  %2122 = vmatpush1.bf16.msra.mxu1 %v3237_v20 }
 0x164   :  { %2037 = vmatprep.subr.bf16.mxu0 %v3242_v22  ;;  %2123 = vmatprep.subr.bf16.mxu1 %v3245_v23 }
 0x167   :  { %2038 = vmatpush1.bf16.msra.mxu0 %v3240_v24  ;;  %2124 = vmatpush1.bf16.msra.mxu1 %v3243_v26 }
 0x168   :  { %2039 = vmatprep.subr.bf16.mxu0 %v3248_v27  ;;  %2125 = vmatprep.subr.bf16.mxu1 %v3251_v28  ;;  %v3294_v27 = vld [vmem:[#allocation4 + $0x200] ss:$16 sps:$4 sm:$0xff]   ;;  %v3297_v28 = vld [vmem:[#allocation4 + $0x208] ss:$16 sps:$4 sm:$0xff]  }
 0x16b   :  { %2040 = vmatpush1.bf16.msra.mxu0 %v3246_v29  ;;  %2126 = vmatpush1.bf16.msra.mxu1 %v3249_v30  ;;  %v3302_v30 = vld [vmem:[#allocation4 + $0x224] ss:$16 sps:$4 sm:$0xff]  }
 0x16c   :  { %2041 = vmatprep.subr.bf16.mxu0 %v3254_v32  ;;  %2127 = vmatprep.subr.bf16.mxu1 %v3257_v33  ;;  %v3305_v32 = vld [vmem:[#allocation4 + $0x22c] ss:$16 sps:$4 sm:$0xff]  }
 0x16f   :  { %2042 = vmatpush1.bf16.msra.mxu0 %v3252_v34  ;;  %2128 = vmatpush1.bf16.msra.mxu1 %v3255_v35  ;;  %v3300_v34 = vld [vmem:[#allocation4 + $0x220] ss:$16 sps:$4 sm:$0xff]   ;;  %v3303_v35 = vld [vmem:[#allocation4 + $0x228] ss:$16 sps:$4 sm:$0xff]  }
 0x170   :  { %2043 = vmatprep.subr.bf16.mxu0 %v3260_v36  ;;  %2129 = vmatprep.subr.bf16.mxu1 %v3263_v38  ;;  %v3308_v36 = vld [vmem:[#allocation4 + $0x244] ss:$16 sps:$4 sm:$0xff]   ;;  %v3311_v38 = vld [vmem:[#allocation4 + $0x24c] ss:$16 sps:$4 sm:$0xff]  }
 0x173   :  { %2044 = vmatpush1.bf16.msra.mxu0 %v3258_v39  ;;  %2130 = vmatpush1.bf16.msra.mxu1 %v3261_v41  ;;  %v3306_v39 = vld [vmem:[#allocation4 + $0x240] ss:$16 sps:$4 sm:$0xff]   ;;  %v3309_v41 = vld [vmem:[#allocation4 + $0x248] ss:$16 sps:$4 sm:$0xff]  }
 0x174   :  { %2045 = vmatprep.subr.bf16.mxu0 %v3266_v42  ;;  %2131 = vmatprep.subr.bf16.mxu1 %v3269_v43  ;;  %v3314_v42 = vld [vmem:[#allocation4 + $0x264] ss:$16 sps:$4 sm:$0xff]   ;;  %v3317_v43 = vld [vmem:[#allocation4 + $0x26c] ss:$16 sps:$4 sm:$0xff]  }
 0x177   :  { %2046 = vmatpush1.bf16.msra.mxu0 %v3264_v44  ;;  %2132 = vmatpush1.bf16.msra.mxu1 %v3267_v45  ;;  %v3312_v44 = vld [vmem:[#allocation4 + $0x260] ss:$16 sps:$4 sm:$0xff]   ;;  %v3315_v45 = vld [vmem:[#allocation4 + $0x268] ss:$16 sps:$4 sm:$0xff]  }
 0x178   :  { %2047 = vmatprep.subr.bf16.mxu0 %v3272_v46  ;;  %2133 = vmatprep.subr.bf16.mxu1 %v3275_v47  ;;  %v3320_v46 = vld [vmem:[#allocation4 + $0x284] ss:$16 sps:$4 sm:$0xff]   ;;  %v3323_v47 = vld [vmem:[#allocation4 + $0x28c] ss:$16 sps:$4 sm:$0xff]  }
 0x17b   :  { %2048 = vmatpush1.bf16.msra.mxu0 %v3270_v48  ;;  %2134 = vmatpush1.bf16.msra.mxu1 %v3273_v49  ;;  %v3318_v48 = vld [vmem:[#allocation4 + $0x280] ss:$16 sps:$4 sm:$0xff]   ;;  %v3321_v49 = vld [vmem:[#allocation4 + $0x288] ss:$16 sps:$4 sm:$0xff]  }
 0x17c   :  { %2049 = vmatprep.subr.bf16.mxu0 %v3278_v50  ;;  %2135 = vmatprep.subr.bf16.mxu1 %v3281_v51  ;;  %v3326_v50 = vld [vmem:[#allocation4 + $0x2a4] ss:$16 sps:$4 sm:$0xff]   ;;  %v3329_v51 = vld [vmem:[#allocation4 + $0x2ac] ss:$16 sps:$4 sm:$0xff]  }
 0x17f   :  { %2050 = vmatpush1.bf16.msra.mxu0 %v3276_v52  ;;  %2136 = vmatpush1.bf16.msra.mxu1 %v3279_v21  ;;  %v3324_v52 = vld [vmem:[#allocation4 + $0x2a0] ss:$16 sps:$4 sm:$0xff]   ;;  %v3327_v21 = vld [vmem:[#allocation4 + $0x2a8] ss:$16 sps:$4 sm:$0xff]  }
 0x180   :  { %2051 = vmatprep.subr.bf16.mxu0 %v3284_v53  ;;  %2137 = vmatprep.subr.bf16.mxu1 %v3287_v54  ;;  %v3332_v53 = vld [vmem:[#allocation4 + $0x2c4] ss:$16 sps:$4 sm:$0xff]   ;;  %v3335_v54 = vld [vmem:[#allocation4 + $0x2cc] ss:$16 sps:$4 sm:$0xff]  }
 0x183   :  { %2052 = vmatpush1.bf16.msra.mxu0 %v3282_v55  ;;  %2138 = vmatpush1.bf16.msra.mxu1 %v3285_v56  ;;  %v3330_v55 = vld [vmem:[#allocation4 + $0x2c0] ss:$16 sps:$4 sm:$0xff]   ;;  %v3333_v56 = vld [vmem:[#allocation4 + $0x2c8] ss:$16 sps:$4 sm:$0xff]  }
 0x184   :  { %2053 = vmatprep.subr.bf16.mxu0 %v3290_v57  ;;  %2139 = vmatprep.subr.bf16.mxu1 %v3293_v58  ;;  %v3338_v57 = vld [vmem:[#allocation4 + $0x2e4] ss:$16 sps:$4 sm:$0xff]   ;;  %v3341_v58 = vld [vmem:[#allocation4 + $0x2ec] ss:$16 sps:$4 sm:$0xff]  }
 0x187   :  { %2054 = vmatpush1.bf16.msra.mxu0 %v3288_v59  ;;  %2140 = vmatpush1.bf16.msra.mxu1 %v3291_v60  ;;  %v3336_v59 = vld [vmem:[#allocation4 + $0x2e0] ss:$16 sps:$4 sm:$0xff]   ;;  %v3339_v60 = vld [vmem:[#allocation4 + $0x2e8] ss:$16 sps:$4 sm:$0xff]  }
 0x188   :  { %2066 = vmatprep.subr.bf16.mxu0 %v3296_v61  ;;  %2152 = vmatprep.subr.bf16.mxu1 %v3299_v62  ;;  %v3344_v61 = vld [vmem:[#allocation4 + $0x304] ss:$16 sps:$4 sm:$0xff]   ;;  %v3347_v62 = vld [vmem:[#allocation4 + $0x30c] ss:$16 sps:$4 sm:$0xff]  }
 0x21d   :  { %v1094_v5 = vpop.f32.mrb[4].mxu0  ;;  %v3610_v6 = vpop.f32.mrb[4].mxu1 }
 0x21e   :  { %v1096_v7 = vpop.f32.mrb[5].mxu0  ;;  %v1182_v8 = vpop.f32.mrb[5].mxu1 }
 0x21f   :  { %v1098_v10 = vpop.f32.mrb[6].mxu0  ;;  %v3613_v11 = vpop.f32.mrb[6].mxu1 }
 0x220   :  { %v1189_v13 = vpack.c.bf16 %v1098_v10, %v1094_v5  ;;  %v1191_v14 = vpack.c.bf16 %v3613_v11, %v3610_v6  ;;  %v1100_v15 = vpop.f32.mrb[7].mxu0  ;;  %v1186_v16 = vpop.f32.mrb[7].mxu1  ;;  %v3359_v5 = vld [vmem:[#allocation4 + $0x34c] ss:$16 sps:$4 sm:$0xff]   ;;  %v3393_v6 = vld [vmem:[%s3754_s7 + $0x80] sm:$0xff]  }
 0x221   :  { %v1190_v18 = vpack.c.bf16 %v1100_v15, %v1096_v7  ;;  %v1192_v20 = vpack.c.bf16 %v1186_v16, %v1182_v8  ;;  %v3354_v7 = vld [vmem:[#allocation4 + $0x340] ss:$16 sps:$4 sm:$0xff]   ;;  %v3357_v8 = vld [vmem:[#allocation4 + $0x348] ss:$16 sps:$4 sm:$0xff]   ;;  %v3365_v10 = vld [vmem:[#allocation4 + $0x36c] ss:$16 sps:$4 sm:$0xff]  }
 0x222   :  { %v1247_v22 = vadd.bf16 %v1225_v9, %v1189_v13  ;;  %v3362_v9 = vld [vmem:[#allocation4 + $0x364] ss:$16 sps:$4 sm:$0xff]   ;;  %v3363_v13 = vld [vmem:[#allocation4 + $0x368] ss:$16 sps:$4 sm:$0xff]   ;;  %v3371_v16 = vld [vmem:[#allocation4 + $0x38c] ss:$16 sps:$4 sm:$0xff]  }
 0x223   :  { %v1248_v23 = vadd.bf16 %v1232_v12, %v1190_v18  ;;  %v1250_v24 = vadd.bf16 %v1246_v17, %v1192_v20  ;;  %v3360_v12 = vld [vmem:[#allocation4 + $0x360] ss:$16 sps:$4 sm:$0xff]   ;;  %v3368_v15 = vld [vmem:[#allocation4 + $0x384] ss:$16 sps:$4 sm:$0xff]   ;;  %v3369_v18 = vld [vmem:[#allocation4 + $0x388] ss:$16 sps:$4 sm:$0xff]   ;;  %v1217_v20 = vcombine.high %v3606_v40, %v3606_v40 }
 0x224   :  { %v1251_v29 = vmax.bf16 %v3482_v0, %v1247_v22  ;;  %v3366_v17 = vld [vmem:[#allocation4 + $0x380] ss:$16 sps:$4 sm:$0xff]   ;;  %v3374_v22 = vld [vmem:[#allocation4 + $0x3a4] ss:$16 sps:$4 sm:$0xff]  }
 0x225   :  { %v1252_v26 = vmax.bf16 %v3482_v0, %v1248_v23  ;;  %v1254_v33 = vmax.bf16 %v3482_v0, %v1250_v24  ;;  %v3377_v23 = vld [vmem:[#allocation4 + $0x3ac] ss:$16 sps:$4 sm:$0xff]   ;;  %v3372_v24 = vld [vmem:[#allocation4 + $0x3a0] ss:$16 sps:$4 sm:$0xff]   ;;  %v3386_v40 = vld [vmem:[#allocation4 + $0x3e4] ss:$16 sps:$4 sm:$0xff]  }
 0x227   :  { %2055 = vmatprep.mubr.bf16.mxu0 %v1252_v26  ;;  %2141 = vmatprep.mubr.bf16.mxu1 %v1252_v26  ;;  %v3375_v26 = vld [vmem:[#allocation4 + $0x3a8] ss:$16 sps:$4 sm:$0xff]  }
 0x228   :  { %2056 = vmatmul.mubr.bf16.vlgmr.msra.gmra.mrb[8].mxu0 %v1251_v29  ;;  %2142 = vmatmul.mubr.bf16.vlgmr.msra.gmra.mrb[8].mxu1 %v1251_v29  ;;  %v3383_v29 = vld [vmem:[#allocation4 + $0x3cc] ss:$16 sps:$4 sm:$0xff]  }
 0x229   :  { %2067 = vmatpush1.bf16.msra.mxu0 %v3294_v27  ;;  %2153 = vmatpush1.bf16.msra.mxu1 %v3297_v28  ;;  %v1234_v27 = vpack.i.b16 %v1217_v20, %v1217_v20  ;;  %v3380_v28 = vld [vmem:[#allocation4 + $0x3c4] ss:$16 sps:$4 sm:$0xff]  }
 0x22a   :  { %2098 = vmatprep.mubr.bf16.mxu0 %v1254_v33  ;;  %2184 = vmatprep.mubr.bf16.mxu1 %v1254_v33 }
 0x22b   :  { %2068 = vmatprep.subr.bf16.mxu0 %v3302_v30  ;;  %2154 = vmatprep.subr.bf16.mxu1 %v3305_v32  ;;  %v3378_v30 = vld [vmem:[#allocation4 + $0x3c0] ss:$16 sps:$4 sm:$0xff]   ;;  %v3381_v32 = vld [vmem:[#allocation4 + $0x3c8] ss:$16 sps:$4 sm:$0xff]   ;;  %v1239_v33 = vrot.slane %v1234_v27, %v3580_v25 }
 0x22d   :  { %2069 = vmatpush1.bf16.msra.mxu0 %v3300_v34  ;;  %2155 = vmatpush1.bf16.msra.mxu1 %v3303_v35  ;;  %v3389_v34 = vld [vmem:[#allocation4 + $0x3ec] ss:$16 sps:$4 sm:$0xff]   ;;  %v3384_v35 = vld [vmem:[#allocation4 + $0x3e0] ss:$16 sps:$4 sm:$0xff]  }
 0x22e   :  { %2070 = vmatprep.subr.bf16.mxu0 %v3308_v36  ;;  %2156 = vmatprep.subr.bf16.mxu1 %v3311_v38  ;;  %v3387_v36 = vld [vmem:[#allocation4 + $0x3e8] ss:$16 sps:$4 sm:$0xff]   ;;  %v1249_v38 = vadd.bf16 %v1239_v33, %v1191_v14 }
 0x22f   :  { %v3394_v14 = vld [vmem:[%s3754_s7 + $0x48] sm:$0xff]  }
 0x230   :  { %v1253_v11 = vmax.bf16 %v3482_v0, %v1249_v38 }
 0x231   :  { %2071 = vmatpush1.bf16.msra.mxu0 %v3306_v39  ;;  %2157 = vmatpush1.bf16.msra.mxu1 %v3309_v41  ;;  %v3390_v39 = vld [vmem:[%s3754_s7 + $0x40] sm:$0xff]  }
 0x232   :  { %2072 = vmatprep.subr.bf16.mxu0 %v3314_v42  ;;  %2158 = vmatprep.subr.bf16.mxu1 %v3317_v43  ;;  %v3391_v41 = vld [vmem:[%s3754_s7 + $0xc0] sm:$0xff]   ;;  %v3395_v43 = vld [vmem:[%s3754_s7 + $0xc8] sm:$0xff]  }
 0x233   :  { %v3392_v42 = vld [vmem:[%s3754_s7] sm:$0xff]  }
 0x235   :  { %2073 = vmatpush1.bf16.msra.mxu0 %v3312_v44  ;;  %2159 = vmatpush1.bf16.msra.mxu1 %v3315_v45  ;;  %v3396_v44 = vld [vmem:[%s3754_s7 + $0x8] sm:$0xff]  }
 0x236   :  { %2074 = vmatprep.subr.bf16.mxu0 %v3320_v46  ;;  %2160 = vmatprep.subr.bf16.mxu1 %v3323_v47  ;;  %v3397_v45 = vld [vmem:[%s3754_s7 + $0x88] sm:$0xff]   ;;  %v3398_v46 = vld [vmem:[%s3754_s7 + $0x50] sm:$0xff]  }
 0x237   :  { %v3399_v47 = vld [vmem:[%s3754_s7 + $0xd0] sm:$0xff]  }
 0x239   :  { %2075 = vmatpush1.bf16.msra.mxu0 %v3318_v48  ;;  %2161 = vmatpush1.bf16.msra.mxu1 %v3321_v49  ;;  %v3400_v48 = vld [vmem:[%s3754_s7 + $0x10] sm:$0xff]  }
 0x23a   :  { %2076 = vmatprep.subr.bf16.mxu0 %v3326_v50  ;;  %2162 = vmatprep.subr.bf16.mxu1 %v3329_v51  ;;  %v3401_v49 = vld [vmem:[%s3754_s7 + $0x90] sm:$0xff]   ;;  %v3402_v50 = vld [vmem:[%s3754_s7 + $0x58] sm:$0xff]  }
 0x23b   :  { %v3403_v51 = vld [vmem:[%s3754_s7 + $0xd8] sm:$0xff]  }
 0x23d   :  { %2077 = vmatpush1.bf16.msra.mxu0 %v3324_v52  ;;  %2163 = vmatpush1.bf16.msra.mxu1 %v3327_v21  ;;  %v3404_v52 = vld [vmem:[%s3754_s7 + $0x18] sm:$0xff]  }
 0x23e   :  { %2078 = vmatprep.subr.bf16.mxu0 %v3332_v53  ;;  %2164 = vmatprep.subr.bf16.mxu1 %v3335_v54  ;;  %v3405_v21 = vld [vmem:[%s3754_s7 + $0x98] sm:$0xff]   ;;  %v3406_v53 = vld [vmem:[%s3754_s7 + $0x60] sm:$0xff]  }
 0x23f   :  { %v3407_v54 = vld [vmem:[%s3754_s7 + $0xe0] sm:$0xff]  }
 0x241   :  { %2079 = vmatpush1.bf16.msra.mxu0 %v3330_v55  ;;  %2165 = vmatpush1.bf16.msra.mxu1 %v3333_v56  ;;  %v3408_v55 = vld [vmem:[%s3754_s7 + $0x20] sm:$0xff]  }
 0x242   :  { %2080 = vmatprep.subr.bf16.mxu0 %v3338_v57  ;;  %2166 = vmatprep.subr.bf16.mxu1 %v3341_v58  ;;  %v3409_v56 = vld [vmem:[%s3754_s7 + $0xa0] sm:$0xff]   ;;  %v3410_v57 = vld [vmem:[%s3754_s7 + $0x68] sm:$0xff]  }
 0x243   :  { %v3411_v58 = vld [vmem:[%s3754_s7 + $0xe8] sm:$0xff]  }
 0x245   :  { %2081 = vmatpush1.bf16.msra.mxu0 %v3336_v59  ;;  %2167 = vmatpush1.bf16.msra.mxu1 %v3339_v60  ;;  %v3412_v59 = vld [vmem:[%s3754_s7 + $0x28] sm:$0xff]  }
 0x246   :  { %2082 = vmatprep.subr.bf16.mxu0 %v3344_v61  ;;  %2168 = vmatprep.subr.bf16.mxu1 %v3347_v62  ;;  %v3413_v60 = vld [vmem:[%s3754_s7 + $0xa8] sm:$0xff]   ;;  %v3414_v61 = vld [vmem:[%s3754_s7 + $0x70] sm:$0xff]  }
 0x247   :  { %v3415_v62 = vld [vmem:[%s3754_s7 + $0xf0] sm:$0xff]  }
 0x249   :  { %2083 = vmatpush1.bf16.msra.mxu0 %v3342_v63  ;;  %2169 = vmatpush1.bf16.msra.mxu1 %v3345_v31  ;;  %v3416_v63 = vld [vmem:[%s3754_s7 + $0x30] sm:$0xff]  }
 0x24a   :  { %2084 = vmatprep.subr.bf16.mxu0 %v3350_v37  ;;  %2170 = vmatprep.subr.bf16.mxu1 %v3353_v1  ;;  %v3417_v31 = vld [vmem:[%s3754_s7 + $0xb0] sm:$0xff]   ;;  %v3418_v37 = vld [vmem:[%s3754_s7 + $0x78] sm:$0xff]  }
 0x24b   :  { %v3419_v1 = vld [vmem:[%s3754_s7 + $0xf8] sm:$0xff]  }
 0x24d   :  { %2085 = vmatpush1.bf16.msra.mxu0 %v3348_v2  ;;  %2171 = vmatpush1.bf16.msra.mxu1 %v3351_v3  ;;  %v3420_v2 = vld [vmem:[%s3754_s7 + $0x38] sm:$0xff]  }
 0x24e   :  { %2086 = vmatprep.subr.bf16.mxu0 %v3356_v4  ;;  %2172 = vmatprep.subr.bf16.mxu1 %v3359_v5  ;;  %v3421_v3 = vld [vmem:[%s3754_s7 + $0xb8] sm:$0xff]   ;;  %v2901_v4 = vld.sshfl [vmem:[%s3753_s6] sm:$0x33 pattern:$0x75316420] }
 0x24f   :  { %v2208_v5 = vcombine.high %v2901_v4, %v2901_v4 }
 0x251   :  { %2087 = vmatpush1.bf16.msra.mxu0 %v3354_v7  ;;  %2173 = vmatpush1.bf16.msra.mxu1 %v3357_v8  ;;  %v2215_v7 = vrot.slane %v2901_v4, %v3572_v19  ;;  %v2222_v8 = vrot.slane %v2208_v5, %v3572_v19 }
 0x252   :  { %2088 = vmatprep.subr.bf16.mxu0 %v3362_v9  ;;  %2174 = vmatprep.subr.bf16.mxu1 %v3365_v10 }
 0x253   :  { %v2223_v9 = vcombine.high %v2215_v7, %v2215_v7  ;;  %v2224_v10 = vcombine.high %v2222_v8, %v2222_v8 }
 0x255   :  { %2089 = vmatpush1.bf16.msra.mxu0 %v3360_v12  ;;  %2175 = vmatpush1.bf16.msra.mxu1 %v3363_v13  ;;  %v2226_v12 = vpack.i.b16 %v2215_v7, %v2215_v7  ;;  %v2240_v13 = vpack.i.b16 %v2223_v9, %v2223_v9 }
 0x256   :  { %2090 = vmatprep.subr.bf16.mxu0 %v3368_v15  ;;  %2176 = vmatprep.subr.bf16.mxu1 %v3371_v16  ;;  %v2233_v15 = vpack.i.b16 %v2222_v8, %v2222_v8  ;;  %v2247_v16 = vpack.i.b16 %v2224_v10, %v2224_v10 }
 0x258   :  { %v2252_v19 = vrot.slane %v2247_v16, %v3580_v25 }
 0x259   :  { %2091 = vmatpush1.bf16.msra.mxu0 %v3366_v17  ;;  %2177 = vmatpush1.bf16.msra.mxu1 %v3369_v18 }
 0x25a   :  { %2092 = vmatprep.subr.bf16.mxu0 %v3374_v22  ;;  %2178 = vmatprep.subr.bf16.mxu1 %v3377_v23  ;;  %v2231_v23 = vrot.slane %v2226_v12, %v3580_v25 }
 0x25d   :  { %2093 = vmatpush1.bf16.msra.mxu0 %v3372_v24  ;;  %2179 = vmatpush1.bf16.msra.mxu1 %v3375_v26  ;;  %v2245_v24 = vrot.slane %v2240_v13, %v3580_v25 }
 0x25e   :  { %2094 = vmatprep.subr.bf16.mxu0 %v3380_v28  ;;  %2180 = vmatprep.subr.bf16.mxu1 %v3383_v29  ;;  %v2238_v28 = vrot.slane %v2233_v15, %v3580_v25 }
 0x261   :  { %2095 = vmatpush1.bf16.msra.mxu0 %v3378_v30  ;;  %2181 = vmatpush1.bf16.msra.mxu1 %v3381_v32 }
 0x262   :  { %2096 = vmatprep.subr.bf16.mxu0 %v3386_v40  ;;  %2182 = vmatprep.subr.bf16.mxu1 %v3389_v34 }
 0x265   :  { %2097 = vmatpush1.bf16.msra.mxu0 %v3384_v35  ;;  %2183 = vmatpush1.bf16.msra.mxu1 %v3387_v36 }
 0x266   :  { %2935 = vmatprep.subr.bf16.mxu0 %v3390_v39  ;;  %2957 = vmatprep.subr.bf16.mxu1 %v3391_v41 }
 0x268   :  { %2099 = vmatmul.mubr.bf16.vlgmr.msra.gmra.mrb[8].mxu0 %v1253_v11  ;;  %2185 = vmatmul.mubr.bf16.vlgmr.msra.gmra.mrb[8].mxu1 %v1253_v11 }
 0x269   :  { %2936 = vmatpush3.bf16.msra.mxu0 %v3392_v42  ;;  %2958 = vmatpush3.bf16.msra.mxu1 %v3393_v6 }
 0x26a   :  { %2937 = vmatprep.subr.bf16.mxu0 %v3394_v14  ;;  %2959 = vmatprep.subr.bf16.mxu1 %v3395_v43  ;;  %v2902_v43 = vld [vmem:[%s3755_s8] ss:$0 sm:$0xff] }
 0x26d   :  { %2938 = vmatpush3.bf16.msra.mxu0 %v3396_v44  ;;  %2960 = vmatpush3.bf16.msra.mxu1 %v3397_v45 }
 0x26e   :  { %2939 = vmatprep.subr.bf16.mxu0 %v3398_v46  ;;  %2961 = vmatprep.subr.bf16.mxu1 %v3399_v47 }
 0x271   :  { %2940 = vmatpush3.bf16.msra.mxu0 %v3400_v48  ;;  %2962 = vmatpush3.bf16.msra.mxu1 %v3401_v49 }
 0x272   :  { %2941 = vmatprep.subr.bf16.mxu0 %v3402_v50  ;;  %2963 = vmatprep.subr.bf16.mxu1 %v3403_v51 }
 0x275   :  { %2942 = vmatpush3.bf16.msra.mxu0 %v3404_v52  ;;  %2964 = vmatpush3.bf16.msra.mxu1 %v3405_v21 }
 0x276   :  { %2943 = vmatprep.subr.bf16.mxu0 %v3406_v53  ;;  %2965 = vmatprep.subr.bf16.mxu1 %v3407_v54 }
 0x279   :  { %2944 = vmatpush3.bf16.msra.mxu0 %v3408_v55  ;;  %2966 = vmatpush3.bf16.msra.mxu1 %v3409_v56 }
 0x27a   :  { %2945 = vmatprep.subr.bf16.mxu0 %v3410_v57  ;;  %2967 = vmatprep.subr.bf16.mxu1 %v3411_v58 }
 0x27d   :  { %2946 = vmatpush3.bf16.msra.mxu0 %v3412_v59  ;;  %2968 = vmatpush3.bf16.msra.mxu1 %v3413_v60 }
 0x27e   :  { %2947 = vmatprep.subr.bf16.mxu0 %v3414_v61  ;;  %2969 = vmatprep.subr.bf16.mxu1 %v3415_v62 }
 0x281   :  { %2948 = vmatpush3.bf16.msra.mxu0 %v3416_v63  ;;  %2970 = vmatpush3.bf16.msra.mxu1 %v3417_v31 }
 0x282   :  { %2949 = vmatprep.subr.bf16.mxu0 %v3418_v37  ;;  %2971 = vmatprep.subr.bf16.mxu1 %v3419_v1 }
 0x285   :  { %2950 = vmatpush3.bf16.msra.mxu0 %v3420_v2  ;;  %2972 = vmatpush3.bf16.msra.mxu1 %v3421_v3 }
 0x33b   :  { %v2100_v17 = vpop.f32.mrb[8].mxu0  ;;  %v2186_v18 = vpop.f32.mrb[8].mxu1 }
 0x33c   :  { %v2102_v20 = vpop.f32.mrb[9].mxu0  ;;  %v2188_v22 = vpop.f32.mrb[9].mxu1 }
 0x33d   :  { %v2104_v26 = vpop.f32.mrb[10].mxu0  ;;  %v2190_v27 = vpop.f32.mrb[10].mxu1 }
 0x33e   :  { %v2195_v29 = vpack.c.bf16 %v2104_v26, %v2100_v17  ;;  %v2197_v30 = vpack.c.bf16 %v2190_v27, %v2186_v18  ;;  %v2106_v32 = vpop.f32.mrb[11].mxu0  ;;  %v2192_v33 = vpop.f32.mrb[11].mxu1 }
 0x33f   :  { %v2196_v40 = vpack.c.bf16 %v2106_v32, %v2102_v20  ;;  %v2198_v34 = vpack.c.bf16 %v2192_v33, %v2188_v22 }
 0x340   :  { %v2253_v35 = vadd.bf16 %v2231_v23, %v2195_v29  ;;  %v2255_v36 = vadd.bf16 %v2245_v24, %v2197_v30 }
 0x341   :  { %v2254_v38 = vadd.bf16 %v2238_v28, %v2196_v40  ;;  %v2256_v39 = vadd.bf16 %v2252_v19, %v2198_v34 }
 0x342   :  { %v2257_v6 = vmax.bf16 %v3482_v0, %v2253_v35  ;;  %v2259_v11 = vmax.bf16 %v3482_v0, %v2255_v36 }
 0x343   :  { %v2258_v41 = vmax.bf16 %v3482_v0, %v2254_v38  ;;  %v2260_v42 = vmax.bf16 %v3482_v0, %v2256_v39 }
 0x345   :  { %2556 = vmatprep.mubr.bf16.mxu0 %v2258_v41  ;;  %2597 = vmatprep.mubr.bf16.mxu1 %v2260_v42 }
 0x346   :  { %2557 = vmatmul.mubr.bf16.vlgmr.msra.gmra.mrb[12].mxu0 %v2257_v6  ;;  %2598 = vmatmul.mubr.bf16.vlgmr.msra.gmra.mrb[12].mxu1 %v2259_v11 }
 0x419   :  { %v2951_v25 = vpop.f32.mrb[12].mxu0  ;;  %v2973_v14 = vpop.f32.mrb[12].mxu1 }
 0x41a   :  { %v2952_v44 = vpop.f32.mrb[13].mxu0  ;;  %v2974_v45 = vpop.f32.mrb[13].mxu1 }
 0x41b   :  { %v2953_v46 = vadd.f32 %v2952_v44, %v2951_v25  ;;  %v2975_v47 = vadd.f32 %v2974_v45, %v2973_v14  ;;  %v2954_v48 = vpop.f32.mrb[14].mxu0  ;;  %v2976_v49 = vpop.f32.mrb[14].mxu1 }
 0x41c   :  { %v2955_v50 = vpop.f32.mrb[15].mxu0  ;;  %v2977_v51 = vpop.f32.mrb[15].mxu1 }
 0x41d   :  { %v2559_v52 = vadd.f32 %v2953_v46, %v2902_v43  ;;  %v2956_v0 = vadd.f32 %v2955_v50, %v2954_v48  ;;  %v2978_v21 = vadd.f32 %v2977_v51, %v2976_v49 }
 0x41f   :  { %v2562_v53 = vadd.f32 %v2956_v0, %v2902_v43  ;;  %v2600_v54 = vadd.f32 %v2975_v47, %v2559_v52 }
 0x421   :  { %2606 = vmax.xlane.f32.xlu0 %v2600_v54  ;;  %v2603_v55 = vadd.f32 %v2978_v21, %v2562_v53 }
 0x425   :  { %2608 = vmax.xlane.f32.xlu0 %v2603_v55 }
 0x4ae   :  { %v2607_v56 = vpop.xlane.xlu0 %2606 }
 0x4af   :  { %v2610_v57 = vsub.f32 %v2600_v54, %v2607_v56 }
 0x4b1   :  { %v2612_v58 = vmul.f32 1.442695, %v2610_v57 }
 0x4b2   :  { %v2609_v59 = vpop.xlane.xlu0 %2608 }
 0x4b3   :  { %v2611_v60 = vsub.f32 %v2603_v55, %v2609_v59  ;;  %3422 = vpow2.f32 %v2612_v58 }
 0x4b5   :  { %v2614_v61 = vmul.f32 1.442695, %v2611_v60 }
 0x4b7   :  { %3424 = vpow2.f32 %v2614_v61 }
 0x4bd   :  { %v3423_v62 = vpop.eup %3422 }
 0x4be   :  { %2616 = vadd.xlane.f32.xlu1 %v3423_v62 }
 0x4c1   :  { %v3425_v63 = vpop.eup %3424 }
 0x4c2   :  { %2618 = vadd.xlane.f32.xlu1 %v3425_v63 }
 0x54b   :  { %v2617_v31 = vpop.xlane.xlu1 %2616 }
 0x54c   :  { %3426 = vlog2.f32 %v2617_v31 }
 0x54f   :  { %v2619_v37 = vpop.xlane.xlu1 %2618 }
 0x550   :  { %3428 = vlog2.f32 %v2619_v37 }
 0x556   :  { %v3427_v1 = vpop.eup %3426 }
 0x557   :  { %v2621_v2 = vmul.f32 0.6931472, %v3427_v1 }
 0x559   :  { %v2624_v3 = vsub.f32 %v2610_v57, %v2621_v2 }
 0x55a   :  { %v3429_v4 = vpop.eup %3428 }
 0x55b   :  { %2626 = vst [vmem:[%s3756_s9] sm:$0xff] %v2624_v3  ;;  %v2623_v5 = vmul.f32 0.6931472, %v3429_v4 }
 0x55d   :  { %v2625_v7 = vsub.f32 %v2611_v60, %v2623_v5 }
 0x55f   :  { %2627 = vst [vmem:[%s3756_s9 + $0x8] sm:$0xff] %v2625_v7 }
 0x560   :  { %2632 = vsyncpa [#allocation3], 1 }
 0x561   :  { %2633 = vsyncpa [#allocation5], 1 }

</bundles_post_ra>
